<compile_context>
chip_gen: v7x
topology: tpu7x:2x2x1
jax: 0.10.0
libtpu: 0.0.40
codegen_flags: <defaults>
</compile_context>

<pallas_src>
import jax
import jax.numpy as jnp
from jax.experimental import pallas as pl
from jax.experimental.pallas import tpu as pltpu

EPS = 1e-5  # PyTorch nn.LayerNorm default


# --------------------------------------------------------------------------
# In-kernel building blocks
# --------------------------------------------------------------------------
def _layernorm(x, gamma, beta):
    """Centered-variance LayerNorm in fp32 (matches torch.nn.LayerNorm)."""
    mean = jnp.mean(x, axis=-1, keepdims=True)
    d = x - mean
    var = jnp.mean(d * d, axis=-1, keepdims=True)
    return d * (jax.lax.rsqrt(var + EPS) * gamma) + beta


def _residual_block(h, w1, b1, g1, be1, w2, b2, g2, be2):
    """One residual block: fp32 residual/LN, bf16 matmul operands, fp32 acc."""
    y = _layernorm(h, g1, be1)
    y = jnp.dot(y.astype(w1.dtype), w1, preferred_element_type=jnp.float32) + b1
    y = jnp.maximum(y, 0.0)                                      # ReLU
    y = _layernorm(y, g2, be2)
    y = jnp.dot(y.astype(w2.dtype), w2, preferred_element_type=jnp.float32) + b2
    return y + h                                                 # residual (fp32)


# --------------------------------------------------------------------------
# Kernel A: all weights resident in VMEM, in-kernel layer loop
# --------------------------------------------------------------------------
def _resident_kernel(x_ref, win_ref, bin_ref, w1_ref, w2_ref, vec_ref,
                     gf_ref, bf_ref, wh_ref, bh_ref, out_ref):
    h = (jnp.dot(x_ref[...], win_ref[...], preferred_element_type=jnp.float32)
         + bin_ref[...])

    def body(l, h):
        v = vec_ref[l]                 # (8, H): [b1, g1, be1, b2, g2, be2, 0, 0]
        return _residual_block(h, w1_ref[l], v[0:1], v[1:2], v[2:3],
                               w2_ref[l], v[3:4], v[4:5], v[5:6])

    h = jax.lax.fori_loop(0, w1_ref.shape[0], body, h, unroll=True)

    hf = jnp.maximum(_layernorm(h, gf_ref[...], bf_ref[...]), 0.0)
    out_ref[...] = (
        jnp.dot(hf.astype(wh_ref.dtype), wh_ref[...],
                preferred_element_type=jnp.float32) + bh_ref[...]
    ).astype(out_ref.dtype)


# --------------------------------------------------------------------------
# Kernel B: layer-streamed weights, persistent VMEM activation scratch
# --------------------------------------------------------------------------
def _streamed_kernel(x_ref, win_ref, bin_ref, w1_ref, w2_ref, vec_ref,
                     gf_ref, bf_ref, wh_ref, bh_ref, out_ref, h_ref):
    l = pl.program_id(1)

    @pl.when(l == 0)
    def _():
        h_ref[...] = (
            jnp.dot(x_ref[...], win_ref[...], preferred_element_type=jnp.float32)
            + bin_ref[...])

    v = vec_ref[...]                   # (8, H): [b1, g1, be1, b2, g2, be2, 0, 0]
    h_new = _residual_block(h_ref[...], w1_ref[...], v[0:1], v[1:2], v[2:3],
                            w2_ref[...], v[3:4], v[4:5], v[5:6])
    h_ref[...] = h_new

    @pl.when(l == pl.num_programs(1) - 1)
    def _():
        hf = jnp.maximum(_layernorm(h_new, gf_ref[...], bf_ref[...]), 0.0)
        out_ref[...] = (
            jnp.dot(hf.astype(wh_ref.dtype), wh_ref[...],
                    preferred_element_type=jnp.float32) + bh_ref[...]
        ).astype(out_ref.dtype)


# --------------------------------------------------------------------------
# Wrapper
# --------------------------------------------------------------------------
def _round_up(v, m):
    return (v + m - 1) // m * m


def _vmem_capacity_bytes():
    try:
        return int(pltpu.get_tpu_info().vmem_capacity_bytes)
    except Exception:
        return 64 * 1024 * 1024        # conservative default (v7x)


def _choose_batch_tile(B):
    """Sublane-aligned tile; >=2 tiles when B >= 16 so v7x uses both TCs."""
    if B >= 1024:
        return 512
    if B >= 512:
        return 256
    if B >= 256:
        return 128
    if B >= 16:
        return _round_up(-(-B // 2), 8)
    return _round_up(max(B, 1), 8)


def prime_factor_mlp(x, params, force_path=None):
    B, In = x.shape
    H = params["win"].shape[1]
    L = params["w1"].shape[0]
    O = params["wp"].shape[1]
    w_bytes = jnp.dtype(params["w1"].dtype).itemsize

    # ---- fuse + lane-pad the two heads -> one (H, O2p) matmul ----
    wh = jnp.concatenate([params["wp"], params["wq"]], axis=1)    # (H, 2*O)
    bh = jnp.concatenate([params["bp"], params["bq"]], axis=1)    # (1, 2*O)
    O2 = 2 * O
    O2p = _round_up(O2, 128)
    if O2p != O2:
        wh = jnp.pad(wh, ((0, 0), (0, O2p - O2)))
        bh = jnp.pad(bh, ((0, 0), (0, O2p - O2)))

    # ---- pack the six per-layer (1,H) vectors into one (L, 8, H) operand ----
    vecs = jnp.stack(
        [params["b1"][:, 0], params["g1"][:, 0], params["be1"][:, 0],
         params["b2"][:, 0], params["g2"][:, 0], params["be2"][:, 0]], axis=1)
    vecs = jnp.pad(vecs, ((0, 0), (0, 2), (0, 0)))                # (L, 8, H)

    # ---- lane-pad input dim, pre-cast x to bf16, pad batch to the tile ----
    Inp = _round_up(In, 128)
    win = params["win"]
    if Inp != In:
        win = jnp.pad(win, ((0, Inp - In), (0, 0)))
    tb = _choose_batch_tile(B)
    Bp = _round_up(B, tb)
    nbt = Bp // tb
    xk = x.astype(jnp.bfloat16)
    if (Bp, Inp) != (B, In):
        xk = jnp.pad(xk, ((0, Bp - B), (0, Inp - In)))

    # ---- generation-aware VMEM budgeting ----
    vmem_cap = _vmem_capacity_bytes()
    vmem_limit = int(min(vmem_cap * 3 // 4, 100 * 1024 * 1024))
    weight_bytes = (Inp * H + 2 * L * H * H + H * O2p) * w_bytes
    vec_bytes = (L * 8 * H + 3 * H + O2p) * 4
    act_bytes = 2 * (tb * Inp * 2 + tb * O2p * 4)   # double-buffered x / out tiles
    tmp_bytes = 8 * tb * H * 4                      # fp32 activation temporaries
    resident_budget = max(8 << 20, min(vmem_cap // 2, 40 << 20))
    use_resident = (weight_bytes + vec_bytes + act_bytes + tmp_bytes
                    <= resident_budget)
    if force_path == "resident":
        use_resident = True
    elif force_path == "streamed":
        use_resident = False

    # Advisory cost estimate (weights re-read per batch tile only if streamed).
    w_reads = 1 if use_resident else nbt
    cost = pl.CostEstimate(
        flops=int(2 * Bp * (Inp * H + 2 * L * H * H + H * O2p)),
        transcendentals=int(Bp * (2 * L + 1)),
        bytes_accessed=int(w_reads * (weight_bytes + vec_bytes)
                           + Bp * Inp * 2 + Bp * O2p * 4),
    )

    operands = (xk, win, params["bin"], params["w1"], params["w2"], vecs,
                params["gf"], params["bf"], wh, bh)

    if use_resident:
        out = pl.pallas_call(
            _resident_kernel,
            out_shape=jax.ShapeDtypeStruct((Bp, O2p), jnp.float32),
            grid=(nbt,),
            in_specs=[
                pl.BlockSpec((tb, Inp), lambda b: (b, 0)),       # x
                pl.BlockSpec((Inp, H), lambda b: (0, 0)),        # win
                pl.BlockSpec((1, H), lambda b: (0, 0)),          # bin
                pl.BlockSpec((L, H, H), lambda b: (0, 0, 0)),    # w1 (resident)
                pl.BlockSpec((L, H, H), lambda b: (0, 0, 0)),    # w2 (resident)
                pl.BlockSpec((L, 8, H), lambda b: (0, 0, 0)),    # packed vectors
                pl.BlockSpec((1, H), lambda b: (0, 0)),          # gf
                pl.BlockSpec((1, H), lambda b: (0, 0)),          # bf
                pl.BlockSpec((H, O2p), lambda b: (0, 0)),        # fused heads
                pl.BlockSpec((1, O2p), lambda b: (0, 0)),        # fused head bias
            ],
            out_specs=pl.BlockSpec((tb, O2p), lambda b: (b, 0)),
            compiler_params=pltpu.CompilerParams(
                dimension_semantics=("parallel",),
                vmem_limit_bytes=vmem_limit,
            ),
            cost_estimate=cost,
        )(*operands)
    else:
        out = pl.pallas_call(
            _streamed_kernel,
            out_shape=jax.ShapeDtypeStruct((Bp, O2p), jnp.float32),
            grid=(nbt, L),
            in_specs=[
                pl.BlockSpec((tb, Inp), lambda b, l: (b, 0)),        # x
                pl.BlockSpec((Inp, H), lambda b, l: (0, 0)),         # win
                pl.BlockSpec((1, H), lambda b, l: (0, 0)),           # bin
                pl.BlockSpec((None, H, H), lambda b, l: (l, 0, 0)),  # w1 (streamed)
                pl.BlockSpec((None, H, H), lambda b, l: (l, 0, 0)),  # w2 (streamed)
                pl.BlockSpec((None, 8, H), lambda b, l: (l, 0, 0)),  # packed vectors
                pl.BlockSpec((1, H), lambda b, l: (0, 0)),           # gf
                pl.BlockSpec((1, H), lambda b, l: (0, 0)),           # bf
                pl.BlockSpec((H, O2p), lambda b, l: (0, 0)),         # fused heads
                pl.BlockSpec((1, O2p), lambda b, l: (0, 0)),         # fused head bias
            ],
            out_specs=pl.BlockSpec((tb, O2p), lambda b, l: (b, 0)),
            scratch_shapes=[pltpu.VMEM((tb, H), jnp.float32)],
            compiler_params=pltpu.CompilerParams(
                dimension_semantics=("parallel", "arbitrary"),
                vmem_limit_bytes=vmem_limit,
            ),
            cost_estimate=cost,
        )(*operands)

    return out[:B, :O], out[:B, O:O2]


# --------------------------------------------------------------------------
# Params / reference
# --------------------------------------------------------------------------
def init_params(key, input_dim, hidden_dim, output_dim, num_layers,
                weight_dtype=jnp.bfloat16):
    ks = jax.random.split(key, 10)
    s_in = input_dim ** -0.5
    s_h = hidden_dim ** -0.5

    def u(k, shape, scale, dtype):
        return jax.random.uniform(k, shape, jnp.float32, -scale, scale).astype(dtype)

    return {
        # weights in bf16 (bandwidth-bound), biases / norm params in fp32
        "win": u(ks[0], (input_dim, hidden_dim), s_in, weight_dtype),
        "bin": u(ks[1], (1, hidden_dim), s_in, jnp.float32),
        "w1": u(ks[2], (num_layers, hidden_dim, hidden_dim), s_h, weight_dtype),
        "b1": u(ks[3], (num_layers, 1, hidden_dim), s_h, jnp.float32),
        "w2": u(ks[4], (num_layers, hidden_dim, hidden_dim), s_h, weight_dtype),
        "b2": u(ks[5], (num_layers, 1, hidden_dim), s_h, jnp.float32),
        "g1": jnp.ones((num_layers, 1, hidden_dim), jnp.float32),
        "be1": jnp.zeros((num_layers, 1, hidden_dim), jnp.float32),
        "g2": jnp.ones((num_layers, 1, hidden_dim), jnp.float32),
        "be2": jnp.zeros((num_layers, 1, hidden_dim), jnp.float32),
        "gf": jnp.ones((1, hidden_dim), jnp.float32),
        "bf": jnp.zeros((1, hidden_dim), jnp.float32),
        "wp": u(ks[6], (hidden_dim, output_dim), s_h, weight_dtype),
        "bp": u(ks[7], (1, output_dim), s_h, jnp.float32),
        "wq": u(ks[8], (hidden_dim, output_dim), s_h, weight_dtype),
        "bq": u(ks[9], (1, output_dim), s_h, jnp.float32),
    }


def reference_forward(x, p):
    """Pure-JAX reference with the same bf16-weight/activation quantization as
    the kernel (fp32 LayerNorm + fp32 accumulation)."""
    def ln(v, g, b):
        m = jnp.mean(v, axis=-1, keepdims=True)
        var = jnp.mean((v - m) ** 2, axis=-1, keepdims=True)
        return (v - m) * jax.lax.rsqrt(var + EPS) * g + b

    def mm(a, w):
        return jnp.dot(a.astype(w.dtype), w, preferred_element_type=jnp.float32)

    h = mm(x, p["win"]) + p["bin"]
    for l in range(p["w1"].shape[0]):
        idn = h
        y = ln(h, p["g1"][l], p["be1"][l])
        y = jnp.maximum(mm(y, p["w1"][l]) + p["b1"][l], 0.0)
        y = ln(y, p["g2"][l], p["be2"][l])
        y = mm(y, p["w2"][l]) + p["b2"][l]
        h = y + idn
    h = jnp.maximum(ln(h, p["gf"], p["bf"]), 0.0)
    return mm(h, p["wp"]) + p["bp"], mm(h, p["wq"]) + p["bq"]


if __name__ == "__main__":
    key = jax.random.PRNGKey(0)
    k_x, k_p = jax.random.split(key)

    batch = 8
    input_dim = 64
    hidden_dim = 128
    output_dim = 64
    num_layers = 3

    x = jax.random.normal(k_x, (batch, input_dim), jnp.float32)
    params = init_params(k_p, input_dim, hidden_dim, output_dim, num_layers)

    p_ref, q_ref = reference_forward(x, params)

    # Exercise both code paths (resident weights / layer-streamed) plus the
    # automatic VMEM-budget-based selection.
    for path in ("resident", "streamed", None):
        p_pred, q_pred = prime_factor_mlp(x, params, force_path=path)
        p_pred = jax.block_until_ready(p_pred)
        q_pred = jax.block_until_ready(q_pred)
        assert p_pred.shape == (batch, output_dim)
        assert q_pred.shape == (batch, output_dim)
        assert jnp.allclose(p_pred, p_ref, atol=5e-3, rtol=5e-3), \
            (path, float(jnp.max(jnp.abs(p_pred - p_ref))))
        assert jnp.allclose(q_pred, q_ref, atol=5e-3, rtol=5e-3), \
            (path, float(jnp.max(jnp.abs(q_pred - q_ref))))

    print("KERNEL_OK")
</pallas_src>

<mosaic_0001>
module attributes {stable_mosaic.version = 11 : i64} {
  func.func @_resident_kernel(%arg0: i32, %arg1: memref<8x128xbf16, #tpu.memory_space<vmem>>, %arg2: memref<128x128xbf16, #tpu.memory_space<vmem>>, %arg3: memref<1x128xf32, #tpu.memory_space<vmem>>, %arg4: memref<3x128x128xbf16, #tpu.memory_space<vmem>>, %arg5: memref<3x128x128xbf16, #tpu.memory_space<vmem>>, %arg6: memref<3x8x128xf32, #tpu.memory_space<vmem>>, %arg7: memref<1x128xf32, #tpu.memory_space<vmem>>, %arg8: memref<1x128xf32, #tpu.memory_space<vmem>>, %arg9: memref<128x128xbf16, #tpu.memory_space<vmem>>, %arg10: memref<1x128xf32, #tpu.memory_space<vmem>>, %arg11: memref<8x128xf32, #tpu.memory_space<vmem>>) attributes {dimension_semantics = [#tpu.dimension_semantics<parallel>], iteration_bounds = array<i64: 1>, scalar_prefetch = 0 : i64, scratch_operands = 0 : i64, tpu.core_type = #tpu.core_type<tc>, window_params = [{transform_indices = @transform_0, window_bounds = array<i64: 8, 128>}, {pipeline_mode = #tpu.pipeline_mode<synchronous>, transform_indices = @transform_1, window_bounds = array<i64: 128, 128>}, {pipeline_mode = #tpu.pipeline_mode<synchronous>, transform_indices = @transform_2, window_bounds = array<i64: 1, 128>}, {pipeline_mode = #tpu.pipeline_mode<synchronous>, transform_indices = @transform_3, window_bounds = array<i64: 3, 128, 128>}, {pipeline_mode = #tpu.pipeline_mode<synchronous>, transform_indices = @transform_4, window_bounds = array<i64: 3, 128, 128>}, {pipeline_mode = #tpu.pipeline_mode<synchronous>, transform_indices = @transform_5, window_bounds = array<i64: 3, 8, 128>}, {pipeline_mode = #tpu.pipeline_mode<synchronous>, transform_indices = @transform_6, window_bounds = array<i64: 1, 128>}, {pipeline_mode = #tpu.pipeline_mode<synchronous>, transform_indices = @transform_7, window_bounds = array<i64: 1, 128>}, {pipeline_mode = #tpu.pipeline_mode<synchronous>, transform_indices = @transform_8, window_bounds = array<i64: 128, 128>}, {pipeline_mode = #tpu.pipeline_mode<synchronous>, transform_indices = @transform_9, window_bounds = array<i64: 1, 128>}, {transform_indices = @transform_10, window_bounds = array<i64: 8, 128>}]} {
    %c0 = arith.constant 0 : index
    %c0_0 = arith.constant 0 : index
    %0 = vector.load %arg1[%c0, %c0_0] : memref<8x128xbf16, #tpu.memory_space<vmem>>, vector<8x128xbf16>
    %c0_1 = arith.constant 0 : index
    %c0_2 = arith.constant 0 : index
    %1 = vector.load %arg2[%c0_1, %c0_2] : memref<128x128xbf16, #tpu.memory_space<vmem>>, vector<128x128xbf16>
    %cst = arith.constant dense<0.000000e+00> : vector<8x128xf32>
    %2 = tpu.matmul %0, %1, %cst {dimension_numbers = #tpu.dot_dimension_numbers<[1], [0], [0], [1], [0, 0, 1, 1], [], []>} : vector<8x128xbf16>, vector<128x128xbf16>, vector<8x128xf32> -> vector<8x128xf32>
    %c0_3 = arith.constant 0 : index
    %c0_4 = arith.constant 0 : index
    %3 = vector.load %arg3[%c0_3, %c0_4] : memref<1x128xf32, #tpu.memory_space<vmem>>, vector<1x128xf32>
    %4 = vector.broadcast %3 : vector<1x128xf32> to vector<8x128xf32>
    %5 = arith.addf %2, %4 : vector<8x128xf32>
    %c0_i32 = arith.constant 0 : i32
    %6 = arith.index_cast %c0_i32 : i32 to index
    %c0_5 = arith.constant 0 : index
    %c0_6 = arith.constant 0 : index
    %7 = vector.load %arg6[%6, %c0_5, %c0_6] : memref<3x8x128xf32, #tpu.memory_space<vmem>>, vector<1x8x128xf32>
    %8 = vector.shape_cast %7 : vector<1x8x128xf32> to vector<8x128xf32>
    %9 = arith.index_cast %c0_i32 : i32 to index
    %c0_7 = arith.constant 0 : index
    %c0_8 = arith.constant 0 : index
    %10 = vector.load %arg4[%9, %c0_7, %c0_8] : memref<3x128x128xbf16, #tpu.memory_space<vmem>>, vector<1x128x128xbf16>
    %11 = vector.shape_cast %10 : vector<1x128x128xbf16> to vector<128x128xbf16>
    %12 = vector.extract_strided_slice %8 {offsets = [0, 0], sizes = [1, 128], strides = [1, 1]} : vector<8x128xf32> to vector<1x128xf32>
    %13 = vector.extract_strided_slice %8 {offsets = [1, 0], sizes = [1, 128], strides = [1, 1]} : vector<8x128xf32> to vector<1x128xf32>
    %14 = vector.extract_strided_slice %8 {offsets = [2, 0], sizes = [1, 128], strides = [1, 1]} : vector<8x128xf32> to vector<1x128xf32>
    %15 = arith.index_cast %c0_i32 : i32 to index
    %c0_9 = arith.constant 0 : index
    %c0_10 = arith.constant 0 : index
    %16 = vector.load %arg5[%15, %c0_9, %c0_10] : memref<3x128x128xbf16, #tpu.memory_space<vmem>>, vector<1x128x128xbf16>
    %17 = vector.shape_cast %16 : vector<1x128x128xbf16> to vector<128x128xbf16>
    %18 = vector.extract_strided_slice %8 {offsets = [3, 0], sizes = [1, 128], strides = [1, 1]} : vector<8x128xf32> to vector<1x128xf32>
    %19 = vector.extract_strided_slice %8 {offsets = [4, 0], sizes = [1, 128], strides = [1, 1]} : vector<8x128xf32> to vector<1x128xf32>
    %20 = vector.extract_strided_slice %8 {offsets = [5, 0], sizes = [1, 128], strides = [1, 1]} : vector<8x128xf32> to vector<1x128xf32>
    %cst_11 = arith.constant dense<0.000000e+00> : vector<8xf32>
    %21 = vector.multi_reduction <add>, %5, %cst_11 [1] : vector<8x128xf32> to vector<8xf32>
    %22 = vector.shape_cast %21 : vector<8xf32> to vector<8x1xf32>
    %cst_12 = arith.constant 1.280000e+02 : f32
    %23 = vector.broadcast %cst_12 : f32 to vector<8x1xf32>
    %24 = arith.divf %22, %23 : vector<8x1xf32>
    %25 = vector.broadcast %24 : vector<8x1xf32> to vector<8x128xf32>
    %26 = arith.subf %5, %25 : vector<8x128xf32>
    %27 = arith.mulf %26, %26 : vector<8x128xf32>
    %cst_13 = arith.constant dense<0.000000e+00> : vector<8xf32>
    %28 = vector.multi_reduction <add>, %27, %cst_13 [1] : vector<8x128xf32> to vector<8xf32>
    %29 = vector.shape_cast %28 : vector<8xf32> to vector<8x1xf32>
    %cst_14 = arith.constant 1.280000e+02 : f32
    %30 = vector.broadcast %cst_14 : f32 to vector<8x1xf32>
    %31 = arith.divf %29, %30 : vector<8x1xf32>
    %cst_15 = arith.constant 9.99999974E-6 : f32
    %32 = vector.broadcast %cst_15 : f32 to vector<8x1xf32>
    %33 = arith.addf %31, %32 : vector<8x1xf32>
    %34 = math.rsqrt %33 : vector<8x1xf32>
    %35 = vector.broadcast %34 : vector<8x1xf32> to vector<8x128xf32>
    %36 = vector.broadcast %13 : vector<1x128xf32> to vector<8x128xf32>
    %37 = arith.mulf %35, %36 : vector<8x128xf32>
    %38 = arith.mulf %26, %37 : vector<8x128xf32>
    %39 = vector.broadcast %14 : vector<1x128xf32> to vector<8x128xf32>
    %40 = arith.addf %38, %39 : vector<8x128xf32>
    %41 = arith.truncf %40 : vector<8x128xf32> to vector<8x128xbf16>
    %cst_16 = arith.constant dense<0.000000e+00> : vector<8x128xf32>
    %42 = tpu.matmul %41, %11, %cst_16 {dimension_numbers = #tpu.dot_dimension_numbers<[1], [0], [0], [1], [0, 0, 1, 1], [], []>} : vector<8x128xbf16>, vector<128x128xbf16>, vector<8x128xf32> -> vector<8x128xf32>
    %43 = vector.broadcast %12 : vector<1x128xf32> to vector<8x128xf32>
    %44 = arith.addf %42, %43 : vector<8x128xf32>
    %cst_17 = arith.constant 0.000000e+00 : f32
    %45 = vector.broadcast %cst_17 : f32 to vector<8x128xf32>
    %46 = arith.maximumf %44, %45 : vector<8x128xf32>
    %cst_18 = arith.constant dense<0.000000e+00> : vector<8xf32>
    %47 = vector.multi_reduction <add>, %46, %cst_18 [1] : vector<8x128xf32> to vector<8xf32>
    %48 = vector.shape_cast %47 : vector<8xf32> to vector<8x1xf32>
    %cst_19 = arith.constant 1.280000e+02 : f32
    %49 = vector.broadcast %cst_19 : f32 to vector<8x1xf32>
    %50 = arith.divf %48, %49 : vector<8x1xf32>
    %51 = vector.broadcast %50 : vector<8x1xf32> to vector<8x128xf32>
    %52 = arith.subf %46, %51 : vector<8x128xf32>
    %53 = arith.mulf %52, %52 : vector<8x128xf32>
    %cst_20 = arith.constant dense<0.000000e+00> : vector<8xf32>
    %54 = vector.multi_reduction <add>, %53, %cst_20 [1] : vector<8x128xf32> to vector<8xf32>
    %55 = vector.shape_cast %54 : vector<8xf32> to vector<8x1xf32>
    %cst_21 = arith.constant 1.280000e+02 : f32
    %56 = vector.broadcast %cst_21 : f32 to vector<8x1xf32>
    %57 = arith.divf %55, %56 : vector<8x1xf32>
    %cst_22 = arith.constant 9.99999974E-6 : f32
    %58 = vector.broadcast %cst_22 : f32 to vector<8x1xf32>
    %59 = arith.addf %57, %58 : vector<8x1xf32>
    %60 = math.rsqrt %59 : vector<8x1xf32>
    %61 = vector.broadcast %60 : vector<8x1xf32> to vector<8x128xf32>
    %62 = vector.broadcast %19 : vector<1x128xf32> to vector<8x128xf32>
    %63 = arith.mulf %61, %62 : vector<8x128xf32>
    %64 = arith.mulf %52, %63 : vector<8x128xf32>
    %65 = vector.broadcast %20 : vector<1x128xf32> to vector<8x128xf32>
    %66 = arith.addf %64, %65 : vector<8x128xf32>
    %67 = arith.truncf %66 : vector<8x128xf32> to vector<8x128xbf16>
    %cst_23 = arith.constant dense<0.000000e+00> : vector<8x128xf32>
    %68 = tpu.matmul %67, %17, %cst_23 {dimension_numbers = #tpu.dot_dimension_numbers<[1], [0], [0], [1], [0, 0, 1, 1], [], []>} : vector<8x128xbf16>, vector<128x128xbf16>, vector<8x128xf32> -> vector<8x128xf32>
    %69 = vector.broadcast %18 : vector<1x128xf32> to vector<8x128xf32>
    %70 = arith.addf %68, %69 : vector<8x128xf32>
    %71 = arith.addf %70, %5 : vector<8x128xf32>
    %c1_i32 = arith.constant 1 : i32
    %72 = arith.index_cast %c1_i32 : i32 to index
    %c0_24 = arith.constant 0 : index
    %c0_25 = arith.constant 0 : index
    %73 = vector.load %arg6[%72, %c0_24, %c0_25] : memref<3x8x128xf32, #tpu.memory_space<vmem>>, vector<1x8x128xf32>
    %74 = vector.shape_cast %73 : vector<1x8x128xf32> to vector<8x128xf32>
    %75 = arith.index_cast %c1_i32 : i32 to index
    %c0_26 = arith.constant 0 : index
    %c0_27 = arith.constant 0 : index
    %76 = vector.load %arg4[%75, %c0_26, %c0_27] : memref<3x128x128xbf16, #tpu.memory_space<vmem>>, vector<1x128x128xbf16>
    %77 = vector.shape_cast %76 : vector<1x128x128xbf16> to vector<128x128xbf16>
    %78 = vector.extract_strided_slice %74 {offsets = [0, 0], sizes = [1, 128], strides = [1, 1]} : vector<8x128xf32> to vector<1x128xf32>
    %79 = vector.extract_strided_slice %74 {offsets = [1, 0], sizes = [1, 128], strides = [1, 1]} : vector<8x128xf32> to vector<1x128xf32>
    %80 = vector.extract_strided_slice %74 {offsets = [2, 0], sizes = [1, 128], strides = [1, 1]} : vector<8x128xf32> to vector<1x128xf32>
    %81 = arith.index_cast %c1_i32 : i32 to index
    %c0_28 = arith.constant 0 : index
    %c0_29 = arith.constant 0 : index
    %82 = vector.load %arg5[%81, %c0_28, %c0_29] : memref<3x128x128xbf16, #tpu.memory_space<vmem>>, vector<1x128x128xbf16>
    %83 = vector.shape_cast %82 : vector<1x128x128xbf16> to vector<128x128xbf16>
    %84 = vector.extract_strided_slice %74 {offsets = [3, 0], sizes = [1, 128], strides = [1, 1]} : vector<8x128xf32> to vector<1x128xf32>
    %85 = vector.extract_strided_slice %74 {offsets = [4, 0], sizes = [1, 128], strides = [1, 1]} : vector<8x128xf32> to vector<1x128xf32>
    %86 = vector.extract_strided_slice %74 {offsets = [5, 0], sizes = [1, 128], strides = [1, 1]} : vector<8x128xf32> to vector<1x128xf32>
    %cst_30 = arith.constant dense<0.000000e+00> : vector<8xf32>
    %87 = vector.multi_reduction <add>, %71, %cst_30 [1] : vector<8x128xf32> to vector<8xf32>
    %88 = vector.shape_cast %87 : vector<8xf32> to vector<8x1xf32>
    %cst_31 = arith.constant 1.280000e+02 : f32
    %89 = vector.broadcast %cst_31 : f32 to vector<8x1xf32>
    %90 = arith.divf %88, %89 : vector<8x1xf32>
    %91 = vector.broadcast %90 : vector<8x1xf32> to vector<8x128xf32>
    %92 = arith.subf %71, %91 : vector<8x128xf32>
    %93 = arith.mulf %92, %92 : vector<8x128xf32>
    %cst_32 = arith.constant dense<0.000000e+00> : vector<8xf32>
    %94 = vector.multi_reduction <add>, %93, %cst_32 [1] : vector<8x128xf32> to vector<8xf32>
    %95 = vector.shape_cast %94 : vector<8xf32> to vector<8x1xf32>
    %cst_33 = arith.constant 1.280000e+02 : f32
    %96 = vector.broadcast %cst_33 : f32 to vector<8x1xf32>
    %97 = arith.divf %95, %96 : vector<8x1xf32>
    %cst_34 = arith.constant 9.99999974E-6 : f32
    %98 = vector.broadcast %cst_34 : f32 to vector<8x1xf32>
    %99 = arith.addf %97, %98 : vector<8x1xf32>
    %100 = math.rsqrt %99 : vector<8x1xf32>
    %101 = vector.broadcast %100 : vector<8x1xf32> to vector<8x128xf32>
    %102 = vector.broadcast %79 : vector<1x128xf32> to vector<8x128xf32>
    %103 = arith.mulf %101, %102 : vector<8x128xf32>
    %104 = arith.mulf %92, %103 : vector<8x128xf32>
    %105 = vector.broadcast %80 : vector<1x128xf32> to vector<8x128xf32>
    %106 = arith.addf %104, %105 : vector<8x128xf32>
    %107 = arith.truncf %106 : vector<8x128xf32> to vector<8x128xbf16>
    %cst_35 = arith.constant dense<0.000000e+00> : vector<8x128xf32>
    %108 = tpu.matmul %107, %77, %cst_35 {dimension_numbers = #tpu.dot_dimension_numbers<[1], [0], [0], [1], [0, 0, 1, 1], [], []>} : vector<8x128xbf16>, vector<128x128xbf16>, vector<8x128xf32> -> vector<8x128xf32>
    %109 = vector.broadcast %78 : vector<1x128xf32> to vector<8x128xf32>
    %110 = arith.addf %108, %109 : vector<8x128xf32>
    %cst_36 = arith.constant 0.000000e+00 : f32
    %111 = vector.broadcast %cst_36 : f32 to vector<8x128xf32>
    %112 = arith.maximumf %110, %111 : vector<8x128xf32>
    %cst_37 = arith.constant dense<0.000000e+00> : vector<8xf32>
    %113 = vector.multi_reduction <add>, %112, %cst_37 [1] : vector<8x128xf32> to vector<8xf32>
    %114 = vector.shape_cast %113 : vector<8xf32> to vector<8x1xf32>
    %cst_38 = arith.constant 1.280000e+02 : f32
    %115 = vector.broadcast %cst_38 : f32 to vector<8x1xf32>
    %116 = arith.divf %114, %115 : vector<8x1xf32>
    %117 = vector.broadcast %116 : vector<8x1xf32> to vector<8x128xf32>
    %118 = arith.subf %112, %117 : vector<8x128xf32>
    %119 = arith.mulf %118, %118 : vector<8x128xf32>
    %cst_39 = arith.constant dense<0.000000e+00> : vector<8xf32>
    %120 = vector.multi_reduction <add>, %119, %cst_39 [1] : vector<8x128xf32> to vector<8xf32>
    %121 = vector.shape_cast %120 : vector<8xf32> to vector<8x1xf32>
    %cst_40 = arith.constant 1.280000e+02 : f32
    %122 = vector.broadcast %cst_40 : f32 to vector<8x1xf32>
    %123 = arith.divf %121, %122 : vector<8x1xf32>
    %cst_41 = arith.constant 9.99999974E-6 : f32
    %124 = vector.broadcast %cst_41 : f32 to vector<8x1xf32>
    %125 = arith.addf %123, %124 : vector<8x1xf32>
    %126 = math.rsqrt %125 : vector<8x1xf32>
    %127 = vector.broadcast %126 : vector<8x1xf32> to vector<8x128xf32>
    %128 = vector.broadcast %85 : vector<1x128xf32> to vector<8x128xf32>
    %129 = arith.mulf %127, %128 : vector<8x128xf32>
    %130 = arith.mulf %118, %129 : vector<8x128xf32>
    %131 = vector.broadcast %86 : vector<1x128xf32> to vector<8x128xf32>
    %132 = arith.addf %130, %131 : vector<8x128xf32>
    %133 = arith.truncf %132 : vector<8x128xf32> to vector<8x128xbf16>
    %cst_42 = arith.constant dense<0.000000e+00> : vector<8x128xf32>
    %134 = tpu.matmul %133, %83, %cst_42 {dimension_numbers = #tpu.dot_dimension_numbers<[1], [0], [0], [1], [0, 0, 1, 1], [], []>} : vector<8x128xbf16>, vector<128x128xbf16>, vector<8x128xf32> -> vector<8x128xf32>
    %135 = vector.broadcast %84 : vector<1x128xf32> to vector<8x128xf32>
    %136 = arith.addf %134, %135 : vector<8x128xf32>
    %137 = arith.addf %136, %71 : vector<8x128xf32>
    %c2_i32 = arith.constant 2 : i32
    %138 = arith.index_cast %c2_i32 : i32 to index
    %c0_43 = arith.constant 0 : index
    %c0_44 = arith.constant 0 : index
    %139 = vector.load %arg6[%138, %c0_43, %c0_44] : memref<3x8x128xf32, #tpu.memory_space<vmem>>, vector<1x8x128xf32>
    %140 = vector.shape_cast %139 : vector<1x8x128xf32> to vector<8x128xf32>
    %141 = arith.index_cast %c2_i32 : i32 to index
    %c0_45 = arith.constant 0 : index
    %c0_46 = arith.constant 0 : index
    %142 = vector.load %arg4[%141, %c0_45, %c0_46] : memref<3x128x128xbf16, #tpu.memory_space<vmem>>, vector<1x128x128xbf16>
    %143 = vector.shape_cast %142 : vector<1x128x128xbf16> to vector<128x128xbf16>
    %144 = vector.extract_strided_slice %140 {offsets = [0, 0], sizes = [1, 128], strides = [1, 1]} : vector<8x128xf32> to vector<1x128xf32>
    %145 = vector.extract_strided_slice %140 {offsets = [1, 0], sizes = [1, 128], strides = [1, 1]} : vector<8x128xf32> to vector<1x128xf32>
    %146 = vector.extract_strided_slice %140 {offsets = [2, 0], sizes = [1, 128], strides = [1, 1]} : vector<8x128xf32> to vector<1x128xf32>
    %147 = arith.index_cast %c2_i32 : i32 to index
    %c0_47 = arith.constant 0 : index
    %c0_48 = arith.constant 0 : index
    %148 = vector.load %arg5[%147, %c0_47, %c0_48] : memref<3x128x128xbf16, #tpu.memory_space<vmem>>, vector<1x128x128xbf16>
    %149 = vector.shape_cast %148 : vector<1x128x128xbf16> to vector<128x128xbf16>
    %150 = vector.extract_strided_slice %140 {offsets = [3, 0], sizes = [1, 128], strides = [1, 1]} : vector<8x128xf32> to vector<1x128xf32>
    %151 = vector.extract_strided_slice %140 {offsets = [4, 0], sizes = [1, 128], strides = [1, 1]} : vector<8x128xf32> to vector<1x128xf32>
    %152 = vector.extract_strided_slice %140 {offsets = [5, 0], sizes = [1, 128], strides = [1, 1]} : vector<8x128xf32> to vector<1x128xf32>
    %cst_49 = arith.constant dense<0.000000e+00> : vector<8xf32>
    %153 = vector.multi_reduction <add>, %137, %cst_49 [1] : vector<8x128xf32> to vector<8xf32>
    %154 = vector.shape_cast %153 : vector<8xf32> to vector<8x1xf32>
    %cst_50 = arith.constant 1.280000e+02 : f32
    %155 = vector.broadcast %cst_50 : f32 to vector<8x1xf32>
    %156 = arith.divf %154, %155 : vector<8x1xf32>
    %157 = vector.broadcast %156 : vector<8x1xf32> to vector<8x128xf32>
    %158 = arith.subf %137, %157 : vector<8x128xf32>
    %159 = arith.mulf %158, %158 : vector<8x128xf32>
    %cst_51 = arith.constant dense<0.000000e+00> : vector<8xf32>
    %160 = vector.multi_reduction <add>, %159, %cst_51 [1] : vector<8x128xf32> to vector<8xf32>
    %161 = vector.shape_cast %160 : vector<8xf32> to vector<8x1xf32>
    %cst_52 = arith.constant 1.280000e+02 : f32
    %162 = vector.broadcast %cst_52 : f32 to vector<8x1xf32>
    %163 = arith.divf %161, %162 : vector<8x1xf32>
    %cst_53 = arith.constant 9.99999974E-6 : f32
    %164 = vector.broadcast %cst_53 : f32 to vector<8x1xf32>
    %165 = arith.addf %163, %164 : vector<8x1xf32>
    %166 = math.rsqrt %165 : vector<8x1xf32>
    %167 = vector.broadcast %166 : vector<8x1xf32> to vector<8x128xf32>
    %168 = vector.broadcast %145 : vector<1x128xf32> to vector<8x128xf32>
    %169 = arith.mulf %167, %168 : vector<8x128xf32>
    %170 = arith.mulf %158, %169 : vector<8x128xf32>
    %171 = vector.broadcast %146 : vector<1x128xf32> to vector<8x128xf32>
    %172 = arith.addf %170, %171 : vector<8x128xf32>
    %173 = arith.truncf %172 : vector<8x128xf32> to vector<8x128xbf16>
    %cst_54 = arith.constant dense<0.000000e+00> : vector<8x128xf32>
    %174 = tpu.matmul %173, %143, %cst_54 {dimension_numbers = #tpu.dot_dimension_numbers<[1], [0], [0], [1], [0, 0, 1, 1], [], []>} : vector<8x128xbf16>, vector<128x128xbf16>, vector<8x128xf32> -> vector<8x128xf32>
    %175 = vector.broadcast %144 : vector<1x128xf32> to vector<8x128xf32>
    %176 = arith.addf %174, %175 : vector<8x128xf32>
    %cst_55 = arith.constant 0.000000e+00 : f32
    %177 = vector.broadcast %cst_55 : f32 to vector<8x128xf32>
    %178 = arith.maximumf %176, %177 : vector<8x128xf32>
    %cst_56 = arith.constant dense<0.000000e+00> : vector<8xf32>
    %179 = vector.multi_reduction <add>, %178, %cst_56 [1] : vector<8x128xf32> to vector<8xf32>
    %180 = vector.shape_cast %179 : vector<8xf32> to vector<8x1xf32>
    %cst_57 = arith.constant 1.280000e+02 : f32
    %181 = vector.broadcast %cst_57 : f32 to vector<8x1xf32>
    %182 = arith.divf %180, %181 : vector<8x1xf32>
    %183 = vector.broadcast %182 : vector<8x1xf32> to vector<8x128xf32>
    %184 = arith.subf %178, %183 : vector<8x128xf32>
    %185 = arith.mulf %184, %184 : vector<8x128xf32>
    %cst_58 = arith.constant dense<0.000000e+00> : vector<8xf32>
    %186 = vector.multi_reduction <add>, %185, %cst_58 [1] : vector<8x128xf32> to vector<8xf32>
    %187 = vector.shape_cast %186 : vector<8xf32> to vector<8x1xf32>
    %cst_59 = arith.constant 1.280000e+02 : f32
    %188 = vector.broadcast %cst_59 : f32 to vector<8x1xf32>
    %189 = arith.divf %187, %188 : vector<8x1xf32>
    %cst_60 = arith.constant 9.99999974E-6 : f32
    %190 = vector.broadcast %cst_60 : f32 to vector<8x1xf32>
    %191 = arith.addf %189, %190 : vector<8x1xf32>
    %192 = math.rsqrt %191 : vector<8x1xf32>
    %193 = vector.broadcast %192 : vector<8x1xf32> to vector<8x128xf32>
    %194 = vector.broadcast %151 : vector<1x128xf32> to vector<8x128xf32>
    %195 = arith.mulf %193, %194 : vector<8x128xf32>
    %196 = arith.mulf %184, %195 : vector<8x128xf32>
    %197 = vector.broadcast %152 : vector<1x128xf32> to vector<8x128xf32>
    %198 = arith.addf %196, %197 : vector<8x128xf32>
    %199 = arith.truncf %198 : vector<8x128xf32> to vector<8x128xbf16>
    %cst_61 = arith.constant dense<0.000000e+00> : vector<8x128xf32>
    %200 = tpu.matmul %199, %149, %cst_61 {dimension_numbers = #tpu.dot_dimension_numbers<[1], [0], [0], [1], [0, 0, 1, 1], [], []>} : vector<8x128xbf16>, vector<128x128xbf16>, vector<8x128xf32> -> vector<8x128xf32>
    %201 = vector.broadcast %150 : vector<1x128xf32> to vector<8x128xf32>
    %202 = arith.addf %200, %201 : vector<8x128xf32>
    %203 = arith.addf %202, %137 : vector<8x128xf32>
    %c3_i32 = arith.constant 3 : i32
    %c0_62 = arith.constant 0 : index
    %c0_63 = arith.constant 0 : index
    %204 = vector.load %arg7[%c0_62, %c0_63] : memref<1x128xf32, #tpu.memory_space<vmem>>, vector<1x128xf32>
    %c0_64 = arith.constant 0 : index
    %c0_65 = arith.constant 0 : index
    %205 = vector.load %arg8[%c0_64, %c0_65] : memref<1x128xf32, #tpu.memory_space<vmem>>, vector<1x128xf32>
    %cst_66 = arith.constant dense<0.000000e+00> : vector<8xf32>
    %206 = vector.multi_reduction <add>, %203, %cst_66 [1] : vector<8x128xf32> to vector<8xf32>
    %207 = vector.shape_cast %206 : vector<8xf32> to vector<8x1xf32>
    %cst_67 = arith.constant 1.280000e+02 : f32
    %208 = vector.broadcast %cst_67 : f32 to vector<8x1xf32>
    %209 = arith.divf %207, %208 : vector<8x1xf32>
    %210 = vector.broadcast %209 : vector<8x1xf32> to vector<8x128xf32>
    %211 = arith.subf %203, %210 : vector<8x128xf32>
    %212 = arith.mulf %211, %211 : vector<8x128xf32>
    %cst_68 = arith.constant dense<0.000000e+00> : vector<8xf32>
    %213 = vector.multi_reduction <add>, %212, %cst_68 [1] : vector<8x128xf32> to vector<8xf32>
    %214 = vector.shape_cast %213 : vector<8xf32> to vector<8x1xf32>
    %cst_69 = arith.constant 1.280000e+02 : f32
    %215 = vector.broadcast %cst_69 : f32 to vector<8x1xf32>
    %216 = arith.divf %214, %215 : vector<8x1xf32>
    %cst_70 = arith.constant 9.99999974E-6 : f32
    %217 = vector.broadcast %cst_70 : f32 to vector<8x1xf32>
    %218 = arith.addf %216, %217 : vector<8x1xf32>
    %219 = math.rsqrt %218 : vector<8x1xf32>
    %220 = vector.broadcast %219 : vector<8x1xf32> to vector<8x128xf32>
    %221 = vector.broadcast %204 : vector<1x128xf32> to vector<8x128xf32>
    %222 = arith.mulf %220, %221 : vector<8x128xf32>
    %223 = arith.mulf %211, %222 : vector<8x128xf32>
    %224 = vector.broadcast %205 : vector<1x128xf32> to vector<8x128xf32>
    %225 = arith.addf %223, %224 : vector<8x128xf32>
    %cst_71 = arith.constant 0.000000e+00 : f32
    %226 = vector.broadcast %cst_71 : f32 to vector<8x128xf32>
    %227 = arith.maximumf %225, %226 : vector<8x128xf32>
    %228 = arith.truncf %227 : vector<8x128xf32> to vector<8x128xbf16>
    %c0_72 = arith.constant 0 : index
    %c0_73 = arith.constant 0 : index
    %229 = vector.load %arg9[%c0_72, %c0_73] : memref<128x128xbf16, #tpu.memory_space<vmem>>, vector<128x128xbf16>
    %cst_74 = arith.constant dense<0.000000e+00> : vector<8x128xf32>
    %230 = tpu.matmul %228, %229, %cst_74 {dimension_numbers = #tpu.dot_dimension_numbers<[1], [0], [0], [1], [0, 0, 1, 1], [], []>} : vector<8x128xbf16>, vector<128x128xbf16>, vector<8x128xf32> -> vector<8x128xf32>
    %c0_75 = arith.constant 0 : index
    %c0_76 = arith.constant 0 : index
    %231 = vector.load %arg10[%c0_75, %c0_76] : memref<1x128xf32, #tpu.memory_space<vmem>>, vector<1x128xf32>
    %232 = vector.broadcast %231 : vector<1x128xf32> to vector<8x128xf32>
    %233 = arith.addf %230, %232 : vector<8x128xf32>
    %c0_77 = arith.constant 0 : index
    %c0_78 = arith.constant 0 : index
    %234 = vector.load %arg11[%c0_77, %c0_78] : memref<8x128xf32, #tpu.memory_space<vmem>>, vector<8x128xf32>
    tpu.vector_store %arg11[%c0_77, %c0_78], %233 {strides = array<i32>} : memref<8x128xf32, #tpu.memory_space<vmem>>, vector<8x128xf32>,
    return
  }
  func.func @transform_0(%arg0: i32) -> (i32, i32) {
    %c0_i32 = arith.constant 0 : i32
    %c0_i32_0 = arith.constant 0 : i32
    return %arg0, %c0_i32 : i32, i32
  }
  func.func @transform_1(%arg0: i32) -> (i32, i32) {
    %c0_i32 = arith.constant 0 : i32
    %c0_i32_0 = arith.constant 0 : i32
    %c0_i32_1 = arith.constant 0 : i32
    return %c0_i32, %c0_i32_0 : i32, i32
  }
  func.func @transform_2(%arg0: i32) -> (i32, i32) {
    %c0_i32 = arith.constant 0 : i32
    %c0_i32_0 = arith.constant 0 : i32
    %c0_i32_1 = arith.constant 0 : i32
    return %c0_i32, %c0_i32_0 : i32, i32
  }
  func.func @transform_3(%arg0: i32) -> (i32, i32, i32) {
    %c0_i32 = arith.constant 0 : i32
    %c0_i32_0 = arith.constant 0 : i32
    %c0_i32_1 = arith.constant 0 : i32
    %c0_i32_2 = arith.constant 0 : i32
    return %c0_i32, %c0_i32_0, %c0_i32_1 : i32, i32, i32
  }
  func.func @transform_4(%arg0: i32) -> (i32, i32, i32) {
    %c0_i32 = arith.constant 0 : i32
    %c0_i32_0 = arith.constant 0 : i32
    %c0_i32_1 = arith.constant 0 : i32
    %c0_i32_2 = arith.constant 0 : i32
    return %c0_i32, %c0_i32_0, %c0_i32_1 : i32, i32, i32
  }
  func.func @transform_5(%arg0: i32) -> (i32, i32, i32) {
    %c0_i32 = arith.constant 0 : i32
    %c0_i32_0 = arith.constant 0 : i32
    %c0_i32_1 = arith.constant 0 : i32
    %c0_i32_2 = arith.constant 0 : i32
    return %c0_i32, %c0_i32_0, %c0_i32_1 : i32, i32, i32
  }
  func.func @transform_6(%arg0: i32) -> (i32, i32) {
    %c0_i32 = arith.constant 0 : i32
    %c0_i32_0 = arith.constant 0 : i32
    %c0_i32_1 = arith.constant 0 : i32
    return %c0_i32, %c0_i32_0 : i32, i32
  }
  func.func @transform_7(%arg0: i32) -> (i32, i32) {
    %c0_i32 = arith.constant 0 : i32
    %c0_i32_0 = arith.constant 0 : i32
    %c0_i32_1 = arith.constant 0 : i32
    return %c0_i32, %c0_i32_0 : i32, i32
  }
  func.func @transform_8(%arg0: i32) -> (i32, i32) {
    %c0_i32 = arith.constant 0 : i32
    %c0_i32_0 = arith.constant 0 : i32
    %c0_i32_1 = arith.constant 0 : i32
    return %c0_i32, %c0_i32_0 : i32, i32
  }
  func.func @transform_9(%arg0: i32) -> (i32, i32) {
    %c0_i32 = arith.constant 0 : i32
    %c0_i32_0 = arith.constant 0 : i32
    %c0_i32_1 = arith.constant 0 : i32
    return %c0_i32, %c0_i32_0 : i32, i32
  }
  func.func @transform_10(%arg0: i32) -> (i32, i32) {
    %c0_i32 = arith.constant 0 : i32
    %c0_i32_0 = arith.constant 0 : i32
    return %arg0, %c0_i32 : i32, i32
  }
}

</mosaic_0001>

<bundles_post_ra>
// kernel: tpu_custom_call.1
= control target key start
LH: loop header
LB: loop body
LE: loop exit
PB: predicated region body
PF: predicated region fallthrough
CT: control target
= control target key end

     0   :  { %15 = vsyncpa [#allocation3], 0  ;;  %s2064_s0 = inlined_call_operand.hbm [shape: bf16[8,128], index: 0, kind: input, shape index: {}]   ;;  %s2065_s1 = inlined_call_operand.hbm [shape: bf16[128,128], index: 1, kind: input, shape index: {}]   ;;  %s2066_s2 = inlined_call_operand.vmem [shape: f32[1,128], index: 2, kind: input, shape index: {}]   ;;  %s2067_s3 = inlined_call_operand.hbm [shape: bf16[3,128,128], index: 3, kind: input, shape index: {}]   ;;  %s2068_s4 = inlined_call_operand.hbm [shape: bf16[3,128,128], index: 4, kind: input, shape index: {}]   ;;  %s2069_s5 = inlined_call_operand.hbm [shape: f32[3,8,128], index: 5, kind: input, shape index: {}]   ;;  %s2070_s6 = inlined_call_operand.vmem [shape: f32[1,128], index: 6, kind: input, shape index: {}]   ;;  %s2071_s7 = inlined_call_operand.vmem [shape: f32[1,128], index: 7, kind: input, shape index: {}]   ;;  %s2072_s8 = inlined_call_operand.hbm [shape: bf16[128,128], index: 8, kind: input, shape index: {}]   ;;  %s2073_s9 = inlined_call_operand.vmem [shape: f32[1,128], index: 9, kind: input, shape index: {}]   ;;  %s2074_s10 = inlined_call_operand.hbm [shape: f32[8,128], index: 10, kind: output, shape index: {}]  }
   0x1   :  { %16 = vsyncpa [#allocation6], 0 }
   0x2   :  { %17 = vsyncpa [#allocation9], 0 }
   0x3   :  { %18 = vsyncpa [#allocation12], 0 }
   0x4   :  { %19 = vsyncpa [#allocation4], 0  ;;  %s1739_s13 = smov [#allocation5]   ;;  %s1575_s17 = scalar_lea.hbm %s2065_s1, 1024 }
   0x5   :  { %s35_s14 = sshll.u32 %s1739_s13, 4  ;;  %p1576_p0 = scmp.ne.s32.totalorder %s2065_s1, %s1575_s17  ;;  %s36_s14 = int_to_ptr.vmem [resolvable:$true] %s35_s14 }
   0x6   :  { %p1579_p1 = scmp.lt.u32.totalorder %s1575_s17, %s2065_s1 }
   0x8   :  { %p1581_p2 = pnand %p1579_p1, %p1576_p0 }
   0xa   :  { %1584 = shalt.err (!%p1581_p2)
}
   0xb   :  { %s1585_s22 = scalar_lea.vmem %s36_s14, 1024  ;;  %p1590_p4 = scmp.lt.s32.totalorder %s36_s14, %s36_s14 }
   0xc   :  { %p1586_p3 = scmp.ne.s32.totalorder %s36_s14, %s1585_s22  ;;  %p1591_p5 = scmp.lt.s32.totalorder %s1585_s22, %s1585_s22 }
   0xe   :  { %p1592_p6 = por %p1591_p5, %p1590_p4 }
  0x10   :  { %p1593_p7 = pnand %p1592_p6, %p1586_p3 }
  0x12   :  { %1596 = shalt.err (!%p1593_p7)
}
  0x13   :  { %s1740_s23 = smov 64   ;;  %s1741_s24 = smov 4  }
  0x14   :  { %41 = dma.hbm_to_vmem [thread:$0]  %s2065_s1, 1024, %s36_s14, [#allocation6], %s1740_s23, %s1740_s23, %s1741_s24  }
  0x15   :  { %s1742_s27 = smov [#allocation8]   ;;  %s1743_s29 = smov [#allocation2]  }
  0x16   :  { %s61_s28 = sshll.u32 %s1742_s27, 4  ;;  %s26_s30 = sshll.u32 %s1743_s29, 4  ;;  %s62_s28 = int_to_ptr.vmem [resolvable:$true] %s61_s28  ;;  %s27_s30 = int_to_ptr.vmem [resolvable:$true] %s26_s30 }
  0x17   :  { %s1597_s13 = scalar_lea.hbm %s2068_s4, 3072 }
  0x18   :  { %p1598_p8 = scmp.ne.s32.totalorder %s2068_s4, %s1597_s13  ;;  %p1601_p9 = scmp.lt.u32.totalorder %s1597_s13, %s2068_s4 }
  0x1a   :  { %p1603_p10 = pnand %p1601_p9, %p1598_p8 }
  0x1c   :  { %1606 = shalt.err (!%p1603_p10)
}
  0x1d   :  { %s1607_s1 = scalar_lea.vmem %s62_s28, 3072  ;;  %p1612_p12 = scmp.lt.s32.totalorder %s62_s28, %s62_s28 }
  0x1e   :  { %p1608_p11 = scmp.ne.s32.totalorder %s62_s28, %s1607_s1  ;;  %p1613_p13 = scmp.lt.s32.totalorder %s1607_s1, %s1607_s1 }
  0x20   :  { %p1614_p0 = por %p1613_p13, %p1612_p12 }
  0x22   :  { %p1615_p1 = pnand %p1614_p0, %p1608_p11 }
  0x24   :  { %1618 = shalt.err (!%p1615_p1)
}
  0x25   :  { %67 = dma.hbm_to_vmem [thread:$0]  %s2068_s4, 3072, %s62_s28, [#allocation9], %s1740_s23, %s1740_s23, %s1741_s24  }
  0x26   :  { %s1619_s22 = scalar_lea.hbm %s2064_s0, 64 }
  0x27   :  { %p1620_p2 = scmp.ne.s32.totalorder %s2064_s0, %s1619_s22  ;;  %p1623_p3 = scmp.lt.u32.totalorder %s1619_s22, %s2064_s0 }
  0x29   :  { %p1625_p4 = pnand %p1623_p3, %p1620_p2 }
  0x2b   :  { %1628 = shalt.err (!%p1625_p4)
}
  0x2c   :  { %s1629_s11 = scalar_lea.vmem %s27_s30, 64  ;;  %p1634_p6 = scmp.lt.s32.totalorder %s27_s30, %s27_s30 }
  0x2d   :  { %p1630_p5 = scmp.ne.s32.totalorder %s27_s30, %s1629_s11  ;;  %p1635_p7 = scmp.lt.s32.totalorder %s1629_s11, %s1629_s11 }
  0x2f   :  { %p1636_p8 = por %p1635_p7, %p1634_p6 }
  0x31   :  { %p1637_p9 = pnand %p1636_p8, %p1630_p5 }
  0x33   :  { %1640 = shalt.err (!%p1637_p9)
}
  0x34   :  { %29 = dma.hbm_to_vmem [thread:$0]  %s2064_s0, 64, %s27_s30, [#allocation3]  }
  0x35   :  { %s1744_s12 = smov [#allocation7]   ;;  %s1745_s15 = smov [#allocation10]  }
  0x36   :  { %s49_s13 = sshll.u32 %s1744_s12, 4  ;;  %s73_s16 = sshll.u32 %s1745_s15, 4  ;;  %s50_s13 = int_to_ptr.vmem [resolvable:$true] %s49_s13  ;;  %s74_s16 = int_to_ptr.vmem [resolvable:$true] %s73_s16 }
  0x37   :  { %s1641_s1 = scalar_lea.hbm %s2067_s3, 3072 }
  0x38   :  { %p1642_p10 = scmp.ne.s32.totalorder %s2067_s3, %s1641_s1  ;;  %p1645_p11 = scmp.lt.u32.totalorder %s1641_s1, %s2067_s3 }
  0x3a   :  { %p1647_p12 = pnand %p1645_p11, %p1642_p10 }
  0x3c   :  { %1650 = shalt.err (!%p1647_p12)
}
  0x3d   :  { %s1651_s0 = scalar_lea.vmem %s50_s13, 3072  ;;  %p1656_p0 = scmp.lt.s32.totalorder %s50_s13, %s50_s13 }
  0x3e   :  { %p1652_p13 = scmp.ne.s32.totalorder %s50_s13, %s1651_s0  ;;  %p1657_p1 = scmp.lt.s32.totalorder %s1651_s0, %s1651_s0 }
  0x40   :  { %p1658_p2 = por %p1657_p1, %p1656_p0 }
  0x42   :  { %p1659_p3 = pnand %p1658_p2, %p1652_p13 }
  0x44   :  { %1662 = shalt.err (!%p1659_p3)
}
  0x45   :  { %55 = dma.hbm_to_vmem [thread:$0]  %s2067_s3, 3072, %s50_s13, [#allocation6], %s1740_s23, %s1740_s23, %s1741_s24  }
  0x46   :  { %s1663_s27 = scalar_lea.hbm %s2069_s5, 384 }
  0x47   :  { %p1664_p4 = scmp.ne.s32.totalorder %s2069_s5, %s1663_s27  ;;  %p1667_p5 = scmp.lt.u32.totalorder %s1663_s27, %s2069_s5 }
  0x49   :  { %p1669_p6 = pnand %p1667_p5, %p1664_p4 }
  0x4b   :  { %1672 = shalt.err (!%p1669_p6)
}
  0x4c   :  { %s1673_s12 = scalar_lea.vmem %s74_s16, 384  ;;  %p1678_p8 = scmp.lt.s32.totalorder %s74_s16, %s74_s16 }
  0x4d   :  { %p1674_p7 = scmp.ne.s32.totalorder %s74_s16, %s1673_s12  ;;  %p1679_p9 = scmp.lt.s32.totalorder %s1673_s12, %s1673_s12 }
  0x4f   :  { %p1680_p10 = por %p1679_p9, %p1678_p8 }
  0x51   :  { %p1681_p11 = pnand %p1680_p10, %p1674_p7 }
  0x53   :  { %1684 = shalt.err (!%p1681_p11)
}
  0x54   :  { %s1746_s3 = smov 128   ;;  %s1747_s13 = smov 8  }
  0x55   :  { %79 = dma.hbm_to_vmem [thread:$0]  %s2069_s5, 384, %s74_s16, [#allocation9], %s1746_s3, %s1746_s3, %s1747_s13  }
  0x56   :  { %s1748_s18 = smov [#allocation11]   ;;  %s1685_s20 = scalar_lea.hbm %s2072_s8, 1024 }
  0x57   :  { %s89_s1 = sshll.u32 %s1748_s18, 4  ;;  %p1686_p12 = scmp.ne.s32.totalorder %s2072_s8, %s1685_s20  ;;  %s90_s1 = int_to_ptr.vmem [resolvable:$true] %s89_s1 }
  0x58   :  { %p1689_p13 = scmp.lt.u32.totalorder %s1685_s20, %s2072_s8 }
  0x5a   :  { %p1691_p0 = pnand %p1689_p13, %p1686_p12 }
  0x5c   :  { %1694 = shalt.err (!%p1691_p0)
}
  0x5d   :  { %s1695_s25 = scalar_lea.vmem %s90_s1, 1024  ;;  %p1700_p2 = scmp.lt.s32.totalorder %s90_s1, %s90_s1 }
  0x5e   :  { %p1696_p1 = scmp.ne.s32.totalorder %s90_s1, %s1695_s25  ;;  %p1701_p3 = scmp.lt.s32.totalorder %s1695_s25, %s1695_s25 }
  0x60   :  { %p1702_p4 = por %p1701_p3, %p1700_p2 }
  0x62   :  { %p1703_p5 = pnand %p1702_p4, %p1696_p1 }
  0x64   :  { %1706 = shalt.err (!%p1703_p5)
}
  0x65   :  { %95 = dma.hbm_to_vmem [thread:$0]  %s2072_s8, 1024, %s90_s1, [#allocation12], %s1740_s23, %s1740_s23, %s1741_s24  }
  0x66   :  { %1729 = dma.done.wait [#allocation3], 64  }
  0x67   :  { %1730 = vsyncadd [#allocation3], 4294967232 }
  0x68   :  { %1731 = dma.done.wait [#allocation6], 4096  }
  0x69   :  { %1732 = vsyncadd [#allocation6], 4294963200 }
  0x6a   :  { %1733 = dma.done.wait [#allocation9], 3456  }
  0x6b   :  { %1734 = vsyncadd [#allocation9], 4294963840 }
  0x6c   :  { %1735 = dma.done.wait [#allocation12], 1024  }
  0x6d   :  { %1736 = vsyncadd [#allocation12], 4294966272  ;;  %v1749_v0 = vmov 0.0   ;;  %vm1750_vm0 = vmmov 0   ;;  %v1497_v1 = vld [vmem:[#allocation5] sm:$0xff]   ;;  %v1498_v2 = vld [vmem:[#allocation5 + $0x8] sm:$0xff]   ;;  %v273_v29 = vlaneseq }
  0x6e   :  { %1324 = vmatprep.subr.bf16.mxu0 %v1749_v0  ;;  %1340 = vmatprep.mubr.msk.bf16.mxu0 %vm1750_vm0, %v1749_v0  ;;  %v1499_v3 = vld [vmem:[#allocation5 + $0x10] sm:$0xff]   ;;  %v1500_v4 = vld [vmem:[#allocation5 + $0x18] sm:$0xff]   ;;  %v1501_v5 = vld [vmem:[#allocation5 + $0x20] sm:$0xff]   ;;  %s1751_s4 = smov [#allocation13]  }
  0x6f   :  { %1344 = vmatprep.subr.bf16.mxu1 %v1749_v0  ;;  %1360 = vmatprep.mubr.msk.bf16.mxu1 %vm1750_vm0, %v1749_v0  ;;  %v1502_v6 = vld [vmem:[#allocation5 + $0x28] sm:$0xff]   ;;  %v1503_v7 = vld [vmem:[#allocation5 + $0x30] sm:$0xff]   ;;  %v1504_v8 = vld [vmem:[#allocation5 + $0x38] sm:$0xff]   ;;  %v1922_v32 = vshrl.u32 %v273_v29, 7  ;;  %s1172_s28 = sshll.u32 %s1751_s4, 4  ;;  %s1173_s28 = int_to_ptr.vmem [resolvable:$true] %s1172_s28 }
  0x70   :  { %1325 = vmatpush3.bf16.msra.mxu0 %v1497_v1  ;;  %v117_v9 = vld [vmem:[#allocation2] sm:$0xf]  ;;  %v1505_v16 = vld [vmem:[#allocation7] sm:$0xff]   ;;  %v1506_v17 = vld [vmem:[#allocation7 + $0x8] sm:$0xff]   ;;  %p1712_p7 = scmp.lt.s32.totalorder %s1173_s28, %s1173_s28 }
  0x71   :  { %1326 = vmatprep.subr.bf16.mxu0 %v1749_v0  ;;  %v1184_v10 = vld [vmem:[%s2066_s2] ss:$0 sm:$0xff]  ;;  %1345 = vmatpush3.bf16.msra.mxu1 %v1505_v16  ;;  %v1507_v22 = vld [vmem:[#allocation7 + $0x10] sm:$0xff]   ;;  %v1509_v24 = vld [vmem:[#allocation7 + $0x20] sm:$0xff]   ;;  %v1925_v33 = vsub.s32 1, %v1922_v32  ;;  %v1932_v36 = vsub.s32 2, %v1922_v32 }
  0x72   :  { %1346 = vmatprep.subr.bf16.mxu1 %v1749_v0  ;;  %v1508_v23 = vld [vmem:[#allocation7 + $0x18] sm:$0xff]   ;;  %v1510_v25 = vld [vmem:[#allocation7 + $0x28] sm:$0xff]   ;;  %v1511_v26 = vld [vmem:[#allocation7 + $0x30] sm:$0xff]   ;;  %v1939_v43 = vsub.s32 0, %v1922_v32 }
  0x73   :  { %v1512_v27 = vld [vmem:[#allocation7 + $0x38] sm:$0xff]   ;;  %v1927_v34 = vld [vmem:[#allocation10] sm:$0xff]  ;;  %v1514_v52 = vld [vmem:[#allocation8 + $0x8] sm:$0xff]  }
  0x74   :  { %1327 = vmatpush3.bf16.msra.mxu0 %v1498_v2  ;;  %v276_v35 = vrot.slane %v1927_v34, %v1925_v33  ;;  %v282_v39 = vrot.slane %v1927_v34, %v1932_v36  ;;  %v288_v44 = vrot.slane %v1927_v34, %v1939_v43  ;;  %v1513_v51 = vld [vmem:[#allocation8] sm:$0xff]   ;;  %v1515_v57 = vld [vmem:[#allocation8 + $0x10] sm:$0xff]   ;;  %v1516_v58 = vld [vmem:[#allocation8 + $0x18] sm:$0xff]  }
  0x75   :  { %1328 = vmatprep.subr.bf16.mxu0 %v1749_v0  ;;  %1347 = vmatpush3.bf16.msra.mxu1 %v1506_v17  ;;  %v1517_v59 = vld [vmem:[#allocation8 + $0x20] sm:$0xff]   ;;  %v1518_v60 = vld [vmem:[#allocation8 + $0x28] sm:$0xff]   ;;  %v1519_v61 = vld [vmem:[#allocation8 + $0x30] sm:$0xff]  }
  0x76   :  { %1348 = vmatprep.subr.bf16.mxu1 %v1749_v0  ;;  %v1520_v62 = vld [vmem:[#allocation8 + $0x38] sm:$0xff]   ;;  %v1526_v29 = vld [vmem:[#allocation7 + $0x68] sm:$0xff]  }
  0x78   :  { %1329 = vmatpush3.bf16.msra.mxu0 %v1499_v3  ;;  %v1952_v3 = vsub.s32 4, %v1922_v32 }
  0x79   :  { %1330 = vmatprep.subr.bf16.mxu0 %v1749_v0  ;;  %1349 = vmatpush3.bf16.msra.mxu1 %v1507_v22  ;;  %v1522_v22 = vld [vmem:[#allocation7 + $0x48] sm:$0xff]  }
  0x7a   :  { %1350 = vmatprep.subr.bf16.mxu1 %v1749_v0 }
  0x7c   :  { %1331 = vmatpush3.bf16.msra.mxu0 %v1500_v4  ;;  %v391_v4 = vrot.slane %v1927_v34, %v1952_v3 }
  0x7d   :  { %1332 = vmatprep.subr.bf16.mxu0 %v1749_v0  ;;  %1351 = vmatpush3.bf16.msra.mxu1 %v1508_v23 }
  0x7e   :  { %1352 = vmatprep.subr.bf16.mxu1 %v1749_v0 }
  0x80   :  { %1333 = vmatpush3.bf16.msra.mxu0 %v1501_v5  ;;  %v1957_v5 = vsub.s32 5, %v1922_v32 }
  0x81   :  { %1334 = vmatprep.subr.bf16.mxu0 %v1749_v0  ;;  %1353 = vmatpush3.bf16.msra.mxu1 %v1509_v24 }
  0x82   :  { %1354 = vmatprep.subr.bf16.mxu1 %v1749_v0 }
  0x84   :  { %1335 = vmatpush3.bf16.msra.mxu0 %v1502_v6 }
  0x85   :  { %1336 = vmatprep.subr.bf16.mxu0 %v1749_v0  ;;  %1355 = vmatpush3.bf16.msra.mxu1 %v1510_v25 }
  0x86   :  { %1356 = vmatprep.subr.bf16.mxu1 %v1749_v0 }
  0x88   :  { %1337 = vmatpush3.bf16.msra.mxu0 %v1503_v7 }
  0x89   :  { %1338 = vmatprep.subr.bf16.mxu0 %v1749_v0  ;;  %1357 = vmatpush3.bf16.msra.mxu1 %v1511_v26 }
  0x8a   :  { %1358 = vmatprep.subr.bf16.mxu1 %v1749_v0 }
  0x8c   :  { %1339 = vmatpush3.bf16.msra.mxu0 %v1504_v8  ;;  %v397_v8 = vrot.slane %v1927_v34, %v1957_v5 }
  0x8d   :  { %1364 = vmatprep.subr.bf16.mxu0 %v1749_v0  ;;  %1359 = vmatpush3.bf16.msra.mxu1 %v1512_v27  ;;  %v1523_v27 = vld [vmem:[#allocation7 + $0x50] sm:$0xff]  }
  0x8e   :  { %1384 = vmatprep.subr.bf16.mxu1 %v1749_v0 }
  0x8f   :  { %1341 = vmatmul.mubr.bf16.vlgmr.msra.gmra.mrb[0].mxu0 %v117_v9 }
  0x90   :  { %1380 = vmatprep.mubr.msk.bf16.mxu0 %vm1750_vm0, %v1749_v0  ;;  %1365 = vmatpush3.bf16.msra.mxu0 %v1513_v51 }
  0x91   :  { %1366 = vmatprep.subr.bf16.mxu0 %v1749_v0 }
  0x94   :  { %1367 = vmatpush3.bf16.msra.mxu0 %v1514_v52 }
  0x95   :  { %1368 = vmatprep.subr.bf16.mxu0 %v1749_v0 }
  0x98   :  { %1369 = vmatpush3.bf16.msra.mxu0 %v1515_v57 }
  0x99   :  { %1370 = vmatprep.subr.bf16.mxu0 %v1749_v0 }
  0x9c   :  { %1371 = vmatpush3.bf16.msra.mxu0 %v1516_v58 }
  0x9d   :  { %1372 = vmatprep.subr.bf16.mxu0 %v1749_v0 }
  0xa0   :  { %1373 = vmatpush3.bf16.msra.mxu0 %v1517_v59  ;;  %v1531_v59 = vld [vmem:[#allocation8 + $0x50] sm:$0xff]  }
  0xa1   :  { %1374 = vmatprep.subr.bf16.mxu0 %v1749_v0 }
  0xa4   :  { %1375 = vmatpush3.bf16.msra.mxu0 %v1518_v60  ;;  %v1532_v60 = vld [vmem:[#allocation8 + $0x58] sm:$0xff]  }
  0xa5   :  { %1376 = vmatprep.subr.bf16.mxu0 %v1749_v0 }
  0xa8   :  { %1377 = vmatpush3.bf16.msra.mxu0 %v1519_v61  ;;  %v1533_v61 = vld [vmem:[#allocation8 + $0x60] sm:$0xff]  }
  0xa9   :  { %1378 = vmatprep.subr.bf16.mxu0 %v1749_v0 }
  0xac   :  { %1379 = vmatpush3.bf16.msra.mxu0 %v1520_v62  ;;  %v1534_v62 = vld [vmem:[#allocation8 + $0x68] sm:$0xff]  }
  0xad   :  { %1404 = vmatprep.subr.bf16.mxu0 %v1749_v0 }
 0x162   :  { %v223_v11 = vpop.f32.mrb[0].mxu0 }
 0x163   :  { %v1910_v12 = vadd.f32 %v1184_v10, %v223_v11  ;;  %v1342_v13 = vpop.f32.mrb[1].mxu0 }
 0x164   :  { %v226_v14 = vpop.f32.mrb[2].mxu0  ;;  %v1964_v13 = vsub.s32 3, %v1922_v32 }
 0x165   :  { %262 = vadd.xlane.f32.xlu0 %v1910_v12  ;;  %v1343_v15 = vpop.f32.mrb[3].mxu0 }
 0x166   :  { %v403_v14 = vrot.slane %v1927_v34, %v1964_v13 }
 0x1f2   :  { %v263_v18 = vpop.xlane.xlu0 %262 }
 0x1f3   :  { %v265_v19 = vmul.f32 0.0078125, %v263_v18 }
 0x1f5   :  { %v266_v20 = vsub.f32 %v1910_v12, %v265_v19 }
 0x1f7   :  { %v267_v21 = vmul.f32 %v266_v20, %v266_v20 }
 0x1f9   :  { %268 = vadd.xlane.f32.xlu0 %v267_v21  ;;  %v1521_v21 = vld [vmem:[#allocation7 + $0x40] sm:$0xff]  }
 0x286   :  { %v269_v28 = vpop.xlane.xlu0 %268 }
 0x287   :  { %v270_v30 = vmul.f32 0.0078125, %v269_v28  ;;  %v1525_v28 = vld [vmem:[#allocation7 + $0x60] sm:$0xff]  }
 0x289   :  { %v271_v31 = vadd.f32 1e-05, %v270_v30  ;;  %v1527_v30 = vld [vmem:[#allocation7 + $0x70] sm:$0xff]  }
 0x28b   :  { %1561 = vrsqrt.f32 %v271_v31  ;;  %v1528_v31 = vld [vmem:[#allocation7 + $0x78] sm:$0xff]  }
 0x295   :  { %v1562_v37 = vpop.eup %1561 }
 0x296   :  { %v277_v38 = vmul.f32 %v1562_v37, %v276_v35  ;;  %v1981_v37 = vld [vmem:[#allocation10 + $0x8] sm:$0xff] }
 0x298   :  { %v278_v40 = vmul.f32 %v277_v38, %v266_v20  ;;  %v542_v38 = vrot.slane %v1981_v37, %v1925_v33 }
 0x29a   :  { %v283_v41 = vadd.f32 %v282_v39, %v278_v40 }
 0x29c   :  { %v284_v42 = vpack.c.bf16 %v283_v41, %v283_v41  ;;  %v548_v41 = vrot.slane %v1981_v37, %v1932_v36 }
 0x29e   :  { %1361 = vmatmul.mubr.bf16.vlgmr.msra.gmra.mrb[0].mxu1 %v284_v42 }
 0x29f   :  { %1400 = vmatprep.mubr.msk.bf16.mxu1 %vm1750_vm0, %v1749_v0  ;;  %1385 = vmatpush3.bf16.msra.mxu1 %v1521_v21 }
 0x2a0   :  { %1386 = vmatprep.subr.bf16.mxu1 %v1749_v0 }
 0x2a3   :  { %1387 = vmatpush3.bf16.msra.mxu1 %v1522_v22 }
 0x2a4   :  { %1388 = vmatprep.subr.bf16.mxu1 %v1749_v0 }
 0x2a7   :  { %1389 = vmatpush3.bf16.msra.mxu1 %v1523_v27 }
 0x2a8   :  { %1390 = vmatprep.subr.bf16.mxu1 %v1749_v0 }
 0x371   :  { %v371_v45 = vpop.f32.mrb[0].mxu1 }
 0x372   :  { %v372_v46 = vadd.f32 %v371_v45, %v288_v44  ;;  %v1362_v47 = vpop.f32.mrb[1].mxu1 }
 0x373   :  { %v374_v48 = vpop.f32.mrb[2].mxu1 }
 0x374   :  { %v377_v49 = vmax.f32 %v372_v46, 0.0  ;;  %v1363_v50 = vpop.f32.mrb[3].mxu1  ;;  %v554_v46 = vrot.slane %v1981_v37, %v1939_v43 }
 0x376   :  { %378 = vadd.xlane.f32.xlu1 %v377_v49 }
 0x403   :  { %v379_v53 = vpop.xlane.xlu1 %378 }
 0x404   :  { %v380_v54 = vmul.f32 0.0078125, %v379_v53  ;;  %v1529_v53 = vld [vmem:[#allocation8 + $0x40] sm:$0xff]  }
 0x406   :  { %v381_v55 = vsub.f32 %v377_v49, %v380_v54  ;;  %v1530_v54 = vld [vmem:[#allocation8 + $0x48] sm:$0xff]  }
 0x408   :  { %v382_v56 = vmul.f32 %v381_v55, %v381_v55 }
 0x40a   :  { %383 = vadd.xlane.f32.xlu1 %v382_v56 }
 0x497   :  { %v384_v63 = vpop.xlane.xlu1 %383 }
 0x498   :  { %v385_v1 = vmul.f32 0.0078125, %v384_v63  ;;  %v1535_v63 = vld [vmem:[#allocation8 + $0x70] sm:$0xff]  }
 0x49a   :  { %v386_v2 = vadd.f32 1e-05, %v385_v1  ;;  %v1536_v1 = vld [vmem:[#allocation8 + $0x78] sm:$0xff]  }
 0x49c   :  { %1563 = vrsqrt.f32 %v386_v2 }
 0x4a6   :  { %v1564_v6 = vpop.eup %1563 }
 0x4a7   :  { %v392_v7 = vmul.f32 %v1564_v6, %v391_v4 }
 0x4a9   :  { %v393_v9 = vmul.f32 %v392_v7, %v381_v55  ;;  %v657_v7 = vrot.slane %v1981_v37, %v1952_v3 }
 0x4ab   :  { %v398_v10 = vadd.f32 %v397_v8, %v393_v9 }
 0x4ad   :  { %v399_v11 = vpack.c.bf16 %v398_v10, %v398_v10  ;;  %v663_v10 = vrot.slane %v1981_v37, %v1957_v5 }
 0x4af   :  { %1381 = vmatmul.mubr.bf16.vlgmr.msra.gmra.mrb[4].mxu0 %v399_v11 }
 0x4b0   :  { %1420 = vmatprep.mubr.msk.bf16.mxu0 %vm1750_vm0, %v1749_v0  ;;  %1405 = vmatpush3.bf16.msra.mxu0 %v1529_v53 }
 0x4b1   :  { %1406 = vmatprep.subr.bf16.mxu0 %v1749_v0 }
 0x4b4   :  { %1407 = vmatpush3.bf16.msra.mxu0 %v1530_v54 }
 0x4b5   :  { %1408 = vmatprep.subr.bf16.mxu0 %v1749_v0 }
 0x4b8   :  { %1409 = vmatpush3.bf16.msra.mxu0 %v1531_v59  ;;  %v1548_v59 = vld [vmem:[#allocation8 + $0x98] sm:$0xff]  }
 0x4b9   :  { %1410 = vmatprep.subr.bf16.mxu0 %v1749_v0 }
 0x4bc   :  { %1411 = vmatpush3.bf16.msra.mxu0 %v1532_v60  ;;  %v1549_v60 = vld [vmem:[#allocation8 + $0xa0] sm:$0xff]  }
 0x4bd   :  { %1412 = vmatprep.subr.bf16.mxu0 %v1749_v0 }
 0x4c0   :  { %1413 = vmatpush3.bf16.msra.mxu0 %v1533_v61  ;;  %v1550_v61 = vld [vmem:[#allocation8 + $0xa8] sm:$0xff]  }
 0x4c1   :  { %1414 = vmatprep.subr.bf16.mxu0 %v1749_v0 }
 0x4c4   :  { %1415 = vmatpush3.bf16.msra.mxu0 %v1534_v62  ;;  %v1551_v62 = vld [vmem:[#allocation8 + $0xb0] sm:$0xff]  }
 0x4c5   :  { %1416 = vmatprep.subr.bf16.mxu0 %v1749_v0 }
 0x4c8   :  { %1417 = vmatpush3.bf16.msra.mxu0 %v1535_v63  ;;  %v1552_v63 = vld [vmem:[#allocation8 + $0xb8] sm:$0xff]  }
 0x4c9   :  { %1418 = vmatprep.subr.bf16.mxu0 %v1749_v0 }
 0x4cc   :  { %1419 = vmatpush3.bf16.msra.mxu0 %v1536_v1 }
 0x4cd   :  { %1444 = vmatprep.subr.bf16.mxu0 %v1749_v0 }
 0x582   :  { %v486_v15 = vpop.f32.mrb[4].mxu0 }
 0x583   :  { %v487_v16 = vadd.f32 %v486_v15, %v403_v14  ;;  %v1382_v17 = vpop.f32.mrb[5].mxu0 }
 0x584   :  { %v489_v18 = vpop.f32.mrb[6].mxu0 }
 0x585   :  { %v1969_v19 = vadd.f32 %v487_v16, %v1910_v12  ;;  %v1383_v20 = vpop.f32.mrb[7].mxu0  ;;  %v1524_v12 = vld [vmem:[#allocation7 + $0x58] sm:$0xff]   ;;  %v669_v16 = vrot.slane %v1981_v37, %v1964_v13 }
 0x586   :  { %1391 = vmatpush3.bf16.msra.mxu1 %v1524_v12 }
 0x587   :  { %529 = vadd.xlane.f32.xlu0 %v1969_v19  ;;  %1392 = vmatprep.subr.bf16.mxu1 %v1749_v0 }
 0x58a   :  { %1393 = vmatpush3.bf16.msra.mxu1 %v1525_v28 }
 0x58b   :  { %1394 = vmatprep.subr.bf16.mxu1 %v1749_v0 }
 0x58e   :  { %1395 = vmatpush3.bf16.msra.mxu1 %v1526_v29  ;;  %v1539_v29 = vld [vmem:[#allocation7 + $0x90] sm:$0xff]  }
 0x58f   :  { %1396 = vmatprep.subr.bf16.mxu1 %v1749_v0 }
 0x592   :  { %1397 = vmatpush3.bf16.msra.mxu1 %v1527_v30  ;;  %v1541_v30 = vld [vmem:[#allocation7 + $0xa0] sm:$0xff]  }
 0x593   :  { %1398 = vmatprep.subr.bf16.mxu1 %v1749_v0 }
 0x596   :  { %1399 = vmatpush3.bf16.msra.mxu1 %v1528_v31  ;;  %v1542_v31 = vld [vmem:[#allocation7 + $0xa8] sm:$0xff]  }
 0x597   :  { %1424 = vmatprep.subr.bf16.mxu1 %v1749_v0 }
 0x614   :  { %v530_v23 = vpop.xlane.xlu0 %529 }
 0x615   :  { %v531_v24 = vmul.f32 0.0078125, %v530_v23 }
 0x617   :  { %v532_v25 = vsub.f32 %v1969_v19, %v531_v24  ;;  %v1537_v24 = vld [vmem:[#allocation7 + $0x80] sm:$0xff]  }
 0x619   :  { %v533_v26 = vmul.f32 %v532_v25, %v532_v25 }
 0x61b   :  { %534 = vadd.xlane.f32.xlu1 %v533_v26 }
 0x6a8   :  { %v535_v32 = vpop.xlane.xlu1 %534 }
 0x6a9   :  { %v536_v34 = vmul.f32 0.0078125, %v535_v32  ;;  %v1543_v32 = vld [vmem:[#allocation7 + $0xb0] sm:$0xff]  }
 0x6ab   :  { %v537_v35 = vadd.f32 1e-05, %v536_v34  ;;  %v1544_v34 = vld [vmem:[#allocation7 + $0xb8] sm:$0xff]  }
 0x6ad   :  { %1565 = vrsqrt.f32 %v537_v35 }
 0x6b7   :  { %v1566_v39 = vpop.eup %1565 }
 0x6b8   :  { %v543_v40 = vmul.f32 %v1566_v39, %v542_v38  ;;  %v760_v39 = vld [vmem:[#allocation10 + $0x10] sm:$0xff] }
 0x6ba   :  { %v544_v42 = vmul.f32 %v543_v40, %v532_v25  ;;  %v1538_v25 = vld [vmem:[#allocation7 + $0x88] sm:$0xff]   ;;  %v808_v40 = vrot.slane %v760_v39, %v1925_v33  ;;  %v1545_v33 = vld [vmem:[#allocation8 + $0x80] sm:$0xff]  }
 0x6bc   :  { %v549_v44 = vadd.f32 %v548_v41, %v544_v42 }
 0x6be   :  { %v550_v45 = vpack.c.bf16 %v549_v44, %v549_v44  ;;  %v814_v44 = vrot.slane %v760_v39, %v1932_v36 }
 0x6c0   :  { %1401 = vmatmul.mubr.bf16.vlgmr.msra.gmra.mrb[4].mxu1 %v550_v45 }
 0x6c1   :  { %1440 = vmatprep.mubr.msk.bf16.mxu1 %vm1750_vm0, %v1749_v0  ;;  %1425 = vmatpush3.bf16.msra.mxu1 %v1537_v24  ;;  %v1553_v24 = vld [vmem:[#allocation11] sm:$0xff]  }
 0x6c2   :  { %1426 = vmatprep.subr.bf16.mxu1 %v1749_v0 }
 0x6c5   :  { %1427 = vmatpush3.bf16.msra.mxu1 %v1538_v25 }
 0x6c6   :  { %1428 = vmatprep.subr.bf16.mxu1 %v1749_v0 }
 0x6c9   :  { %1429 = vmatpush3.bf16.msra.mxu1 %v1539_v29  ;;  %v1559_v29 = vld [vmem:[#allocation11 + $0x30] sm:$0xff]  }
 0x6ca   :  { %1430 = vmatprep.subr.bf16.mxu1 %v1749_v0 }
 0x793   :  { %v637_v47 = vpop.f32.mrb[4].mxu1 }
 0x794   :  { %v638_v48 = vadd.f32 %v637_v47, %v554_v46  ;;  %v1402_v49 = vpop.f32.mrb[5].mxu1 }
 0x795   :  { %v640_v50 = vpop.f32.mrb[6].mxu1 }
 0x796   :  { %v643_v51 = vmax.f32 %v638_v48, 0.0  ;;  %v1403_v52 = vpop.f32.mrb[7].mxu1  ;;  %v820_v48 = vrot.slane %v760_v39, %v1939_v43  ;;  %v1547_v43 = vld [vmem:[#allocation8 + $0x90] sm:$0xff]  }
 0x798   :  { %644 = vadd.xlane.f32.xlu0 %v643_v51 }
 0x825   :  { %v645_v55 = vpop.xlane.xlu0 %644 }
 0x826   :  { %v646_v56 = vmul.f32 0.0078125, %v645_v55  ;;  %v1546_v55 = vld [vmem:[#allocation8 + $0x88] sm:$0xff]  }
 0x828   :  { %v647_v57 = vsub.f32 %v643_v51, %v646_v56 }
 0x82a   :  { %v648_v58 = vmul.f32 %v647_v57, %v647_v57 }
 0x82c   :  { %649 = vadd.xlane.f32.xlu1 %v648_v58 }
 0x8b9   :  { %v650_v2 = vpop.xlane.xlu1 %649 }
 0x8ba   :  { %v651_v4 = vmul.f32 0.0078125, %v650_v2 }
 0x8bc   :  { %v652_v6 = vadd.f32 1e-05, %v651_v4 }
 0x8be   :  { %1567 = vrsqrt.f32 %v652_v6  ;;  %v923_v6 = vrot.slane %v760_v39, %v1952_v3  ;;  %v1554_v3 = vld [vmem:[#allocation11 + $0x8] sm:$0xff]  }
 0x8c8   :  { %v1568_v8 = vpop.eup %1567 }
 0x8c9   :  { %v658_v9 = vmul.f32 %v1568_v8, %v657_v7 }
 0x8cb   :  { %v659_v11 = vmul.f32 %v658_v9, %v647_v57  ;;  %v929_v9 = vrot.slane %v760_v39, %v1957_v5 }
 0x8cd   :  { %v664_v14 = vadd.f32 %v663_v10, %v659_v11 }
 0x8cf   :  { %v665_v15 = vpack.c.bf16 %v664_v14, %v664_v14 }
 0x8d1   :  { %1421 = vmatmul.mubr.bf16.vlgmr.msra.gmra.mrb[8].mxu0 %v665_v15  ;;  %v935_v15 = vrot.slane %v760_v39, %v1964_v13 }
 0x8d2   :  { %1460 = vmatprep.mubr.msk.bf16.mxu0 %vm1750_vm0, %v1749_v0  ;;  %1445 = vmatpush3.bf16.msra.mxu0 %v1545_v33 }
 0x8d3   :  { %1446 = vmatprep.subr.bf16.mxu0 %v1749_v0 }
 0x8d6   :  { %1447 = vmatpush3.bf16.msra.mxu0 %v1546_v55 }
 0x8d7   :  { %1448 = vmatprep.subr.bf16.mxu0 %v1749_v0 }
 0x8da   :  { %1449 = vmatpush3.bf16.msra.mxu0 %v1547_v43 }
 0x8db   :  { %1450 = vmatprep.subr.bf16.mxu0 %v1749_v0 }
 0x8de   :  { %1451 = vmatpush3.bf16.msra.mxu0 %v1548_v59 }
 0x8df   :  { %1452 = vmatprep.subr.bf16.mxu0 %v1749_v0 }
 0x8e2   :  { %1453 = vmatpush3.bf16.msra.mxu0 %v1549_v60 }
 0x8e3   :  { %1454 = vmatprep.subr.bf16.mxu0 %v1749_v0 }
 0x8e6   :  { %1455 = vmatpush3.bf16.msra.mxu0 %v1550_v61 }
 0x8e7   :  { %1456 = vmatprep.subr.bf16.mxu0 %v1749_v0 }
 0x8ea   :  { %1457 = vmatpush3.bf16.msra.mxu0 %v1551_v62 }
 0x8eb   :  { %1458 = vmatprep.subr.bf16.mxu0 %v1749_v0 }
 0x8ee   :  { %1459 = vmatpush3.bf16.msra.mxu0 %v1552_v63 }
 0x9a4   :  { %v752_v17 = vpop.f32.mrb[8].mxu0 }
 0x9a5   :  { %v753_v18 = vadd.f32 %v752_v17, %v669_v16  ;;  %v1422_v20 = vpop.f32.mrb[9].mxu0 }
 0x9a6   :  { %v755_v21 = vpop.f32.mrb[10].mxu0 }
 0x9a7   :  { %v2008_v22 = vadd.f32 %v753_v18, %v1969_v19  ;;  %v1423_v23 = vpop.f32.mrb[11].mxu0  ;;  %v1540_v19 = vld [vmem:[#allocation7 + $0x98] sm:$0xff]  }
 0x9a8   :  { %1431 = vmatpush3.bf16.msra.mxu1 %v1540_v19  ;;  %v1560_v19 = vld [vmem:[#allocation11 + $0x38] sm:$0xff]  }
 0x9a9   :  { %795 = vadd.xlane.f32.xlu0 %v2008_v22  ;;  %1432 = vmatprep.subr.bf16.mxu1 %v1749_v0 }
 0x9ac   :  { %1433 = vmatpush3.bf16.msra.mxu1 %v1541_v30 }
 0x9ad   :  { %1434 = vmatprep.subr.bf16.mxu1 %v1749_v0 }
 0x9b0   :  { %1435 = vmatpush3.bf16.msra.mxu1 %v1542_v31 }
 0x9b1   :  { %1436 = vmatprep.subr.bf16.mxu1 %v1749_v0 }
 0x9b4   :  { %1437 = vmatpush3.bf16.msra.mxu1 %v1543_v32 }
 0x9b5   :  { %1438 = vmatprep.subr.bf16.mxu1 %v1749_v0 }
 0x9b8   :  { %1439 = vmatpush3.bf16.msra.mxu1 %v1544_v34  ;;  %v1241_v34 = vld [vmem:[%s2070_s6] ss:$0 sm:$0xff]  ;;  %s1707_s6 = scalar_lea.vmem %s1173_s28, 128 }
 0x9b9   :  { %1464 = vmatprep.subr.bf16.mxu1 %v1749_v0  ;;  %p1708_p6 = scmp.ne.s32.totalorder %s1173_s28, %s1707_s6  ;;  %p1713_p8 = scmp.lt.s32.totalorder %s1707_s6, %s1707_s6 }
 0x9bb   :  { %p1714_p9 = por %p1713_p8, %p1712_p7 }
 0x9bd   :  { %p1715_p10 = pnand %p1714_p9, %p1708_p6 }
 0xa36   :  { %v796_v26 = vpop.xlane.xlu0 %795 }
 0xa37   :  { %v797_v27 = vmul.f32 0.0078125, %v796_v26 }
 0xa39   :  { %v798_v12 = vsub.f32 %v2008_v22, %v797_v27  ;;  %v1555_v27 = vld [vmem:[#allocation11 + $0x10] sm:$0xff]  }
 0xa3b   :  { %v799_v28 = vmul.f32 %v798_v12, %v798_v12 }
 0xa3d   :  { %800 = vadd.xlane.f32.xlu1 %v799_v28  ;;  %v1558_v28 = vld [vmem:[#allocation11 + $0x28] sm:$0xff]  }
 0xaca   :  { %v801_v35 = vpop.xlane.xlu1 %800 }
 0xacb   :  { %v802_v37 = vmul.f32 0.0078125, %v801_v35 }
 0xacd   :  { %v803_v38 = vadd.f32 1e-05, %v802_v37 }
 0xacf   :  { %1569 = vrsqrt.f32 %v803_v38  ;;  %v1242_v38 = vld [vmem:[%s2071_s7] ss:$0 sm:$0xff] }
 0xad9   :  { %v1570_v41 = vpop.eup %1569 }
 0xada   :  { %v809_v42 = vmul.f32 %v1570_v41, %v808_v40 }
 0xadc   :  { %v810_v45 = vmul.f32 %v809_v42, %v798_v12  ;;  %v1556_v12 = vld [vmem:[#allocation11 + $0x18] sm:$0xff]  }
 0xade   :  { %v815_v46 = vadd.f32 %v814_v44, %v810_v45 }
 0xae0   :  { %v816_v47 = vpack.c.bf16 %v815_v46, %v815_v46 }
 0xae2   :  { %1441 = vmatmul.mubr.bf16.vlgmr.msra.gmra.mrb[8].mxu1 %v816_v47 }
 0xae3   :  { %1480 = vmatprep.mubr.msk.bf16.mxu1 %vm1750_vm0, %v1749_v0  ;;  %1465 = vmatpush3.bf16.msra.mxu1 %v1553_v24 }
 0xae4   :  { %1466 = vmatprep.subr.bf16.mxu1 %v1749_v0 }
 0xae7   :  { %1467 = vmatpush3.bf16.msra.mxu1 %v1554_v3 }
 0xae8   :  { %1468 = vmatprep.subr.bf16.mxu1 %v1749_v0 }
 0xaeb   :  { %1469 = vmatpush3.bf16.msra.mxu1 %v1555_v27 }
 0xaec   :  { %1470 = vmatprep.subr.bf16.mxu1 %v1749_v0 }
 0xaef   :  { %1471 = vmatpush3.bf16.msra.mxu1 %v1556_v12 }
 0xaf0   :  { %1472 = vmatprep.subr.bf16.mxu1 %v1749_v0 }
 0xbb5   :  { %v903_v49 = vpop.f32.mrb[8].mxu1 }
 0xbb6   :  { %v904_v50 = vadd.f32 %v903_v49, %v820_v48  ;;  %v1442_v51 = vpop.f32.mrb[9].mxu1 }
 0xbb7   :  { %v906_v52 = vpop.f32.mrb[10].mxu1 }
 0xbb8   :  { %v909_v53 = vmax.f32 %v904_v50, 0.0  ;;  %v1443_v54 = vpop.f32.mrb[11].mxu1 }
 0xbba   :  { %910 = vadd.xlane.f32.xlu0 %v909_v53 }
 0xc47   :  { %v911_v36 = vpop.xlane.xlu0 %910 }
 0xc48   :  { %v912_v56 = vmul.f32 0.0078125, %v911_v36 }
 0xc4a   :  { %v913_v57 = vsub.f32 %v909_v53, %v912_v56 }
 0xc4c   :  { %v914_v58 = vmul.f32 %v913_v57, %v913_v57 }
 0xc4e   :  { %915 = vadd.xlane.f32.xlu1 %v914_v58 }
 0xcdb   :  { %v916_v1 = vpop.xlane.xlu1 %915 }
 0xcdc   :  { %v917_v2 = vmul.f32 0.0078125, %v916_v1 }
 0xcde   :  { %v918_v4 = vadd.f32 1e-05, %v917_v2 }
 0xce0   :  { %1571 = vrsqrt.f32 %v918_v4 }
 0xcea   :  { %v1572_v7 = vpop.eup %1571 }
 0xceb   :  { %v924_v8 = vmul.f32 %v1572_v7, %v923_v6 }
 0xced   :  { %v925_v10 = vmul.f32 %v924_v8, %v913_v57 }
 0xcef   :  { %v930_v11 = vadd.f32 %v929_v9, %v925_v10 }
 0xcf1   :  { %v931_v14 = vpack.c.bf16 %v930_v11, %v930_v11 }
 0xcf3   :  { %1461 = vmatmul.mubr.bf16.vlgmr.msra.gmra.mrb[12].mxu0 %v931_v14 }
 0xdc6   :  { %v1018_v16 = vpop.f32.mrb[12].mxu0 }
 0xdc7   :  { %v1019_v17 = vadd.f32 %v1018_v16, %v935_v15  ;;  %v1462_v18 = vpop.f32.mrb[13].mxu0 }
 0xdc8   :  { %v1021_v20 = vpop.f32.mrb[14].mxu0 }
 0xdc9   :  { %v1463_v21 = vpop.f32.mrb[15].mxu0  ;;  %v1024_v23 = vadd.f32 %v1019_v17, %v2008_v22  ;;  %v1557_v22 = vld [vmem:[#allocation11 + $0x20] sm:$0xff]  }
 0xdca   :  { %1473 = vmatpush3.bf16.msra.mxu1 %v1557_v22 }
 0xdcb   :  { %1027 = vadd.xlane.f32.xlu0 %v1024_v23  ;;  %1474 = vmatprep.subr.bf16.mxu1 %v1749_v0 }
 0xdce   :  { %1475 = vmatpush3.bf16.msra.mxu1 %v1558_v28 }
 0xdcf   :  { %1476 = vmatprep.subr.bf16.mxu1 %v1749_v0 }
 0xdd2   :  { %1477 = vmatpush3.bf16.msra.mxu1 %v1559_v29 }
 0xdd3   :  { %1478 = vmatprep.subr.bf16.mxu1 %v1749_v0  ;;  %v1243_v0 = vld [vmem:[%s2073_s9] ss:$0 sm:$0xff] }
 0xdd6   :  { %1479 = vmatpush3.bf16.msra.mxu1 %v1560_v19 }
 0xe58   :  { %v1028_v5 = vpop.xlane.xlu0 %1027 }
 0xe59   :  { %v1029_v25 = vmul.f32 0.0078125, %v1028_v5 }
 0xe5b   :  { %v1030_v26 = vsub.f32 %v1024_v23, %v1029_v25 }
 0xe5d   :  { %v1031_v13 = vmul.f32 %v1030_v26, %v1030_v26 }
 0xe5f   :  { %1032 = vadd.xlane.f32.xlu1 %v1031_v13 }
 0xeec   :  { %v1033_v30 = vpop.xlane.xlu1 %1032 }
 0xeed   :  { %v1034_v31 = vmul.f32 0.0078125, %v1033_v30 }
 0xeef   :  { %v1035_v32 = vadd.f32 1e-05, %v1034_v31 }
 0xef1   :  { %1573 = vrsqrt.f32 %v1035_v32 }
 0xefb   :  { %v1574_v35 = vpop.eup %1573 }
 0xefc   :  { %v1043_v37 = vmul.f32 %v1574_v35, %v1241_v34 }
 0xefe   :  { %v1044_v39 = vmul.f32 %v1043_v37, %v1030_v26 }
 0xf00   :  { %v1051_v40 = vadd.f32 %v1242_v38, %v1044_v39 }
 0xf02   :  { %v1052_v41 = vmax.f32 %v1051_v40, 0.0 }
 0xf04   :  { %v1053_v42 = vpack.c.bf16 %v1052_v41, %v1052_v41 }
 0xf06   :  { %1481 = vmatmul.mubr.bf16.vlgmr.msra.gmra.mrb[12].mxu1 %v1053_v42 }
 0xfd9   :  { %v1159_v44 = vpop.f32.mrb[12].mxu1 }
 0xfda   :  { %v1160_v45 = vadd.f32 %v1243_v0, %v1159_v44  ;;  %v1482_v46 = vpop.f32.mrb[13].mxu1 }
 0xfdb   :  { %v1162_v47 = vpop.f32.mrb[14].mxu1 }
 0xfdc   :  { %1165 = vst [vmem:[#allocation13] sm:$0xff] %v1160_v45  ;;  %v1483_v48 = vpop.f32.mrb[15].mxu1 }
 0xfdd   :  { %1718 = shalt.err (!%p1715_p10)
}
 0xfde   :  { %s1719_s9 = scalar_lea.hbm %s2074_s10, 128 }
 0xfdf   :  { %p1720_p11 = scmp.ne.s32.totalorder %s2074_s10, %s1719_s9  ;;  %p1723_p12 = scmp.lt.u32.totalorder %s1719_s9, %s2074_s10 }
 0xfe1   :  { %p1725_p13 = pnand %p1723_p12, %p1720_p11 }
 0xfe3   :  { %1728 = shalt.err (!%p1725_p13)
}
 0xfe4   :  { %1175 = dma.vmem_to_hbm [thread:$0]  %s1173_s28, 128, %s2074_s10, [#allocation4]  }
 0xfe5   :  { %1737 = dma.done.wait [#allocation4], 128  }
 0xfe6   :  { %1738 = vsyncadd [#allocation4], 4294967168 }
 0xfe7   :  { %1179 = vsyncpa [#allocation3], 1 }
 0xfe8   :  { %1180 = vsyncpa [#allocation6], 1 }
 0xfe9   :  { %1181 = vsyncpa [#allocation9], 1 }
 0xfea   :  { %1182 = vsyncpa [#allocation12], 1 }
 0xfeb   :  { %1183 = vsyncpa [#allocation4], 1 }

</bundles_post_ra>
